<compile_context>
chip_gen: v6e
topology: v6e:2x2x1
jax: 0.10.0
libtpu: 0.0.40
codegen_flags: <defaults>
</compile_context>

<pallas_src>
import functools
import math

import jax
import jax.numpy as jnp
from jax.experimental import pallas as pl
from jax.experimental.pallas import tpu as pltpu


_HIGHEST = jax.lax.Precision.HIGHEST
_NN = (((1,), (0,)), ((), ()))   # a @ b
_NT = (((1,), (1,)), ((), ()))   # a @ b.T  (contract last dims; no explicit transpose)


def _mm(a, b, dnums=_NN):
    return jax.lax.dot_general(
        a, b, dnums,
        preferred_element_type=jnp.float32,
        precision=_HIGHEST,
    )


def _layernorm(t, eps):
    # LayerNorm(elementwise_affine=False): (t - mean) * rsqrt(var + eps), biased var.
    mu = jnp.mean(t, axis=-1, keepdims=True)
    d = t - mu
    var = jnp.mean(d * d, axis=-1, keepdims=True)
    return d * jax.lax.rsqrt(var + eps)


def _attention_kernel(x_ref, wqkv_ref, bqkv_ref, wo_ref, bo_ref, out_ref, *,
                      num_heads: int, head_dim: int, scale: float, eps: float):
    """One batch element per grid step.

    x_ref:    (1, N, D) f32
    wqkv_ref: (D, 3D)   f32 (in->out layout, [Wq | Wk | Wv] along lanes)
    bqkv_ref: (1, 3D)   f32
    wo_ref:   (D, D)    f32
    bo_ref:   (1, D)    f32
    out_ref:  (1, N, D) f32
    """
    x = x_ref[0]                                            # (N, D)
    n, d = x.shape

    # Fused QKV projection: one MXU pass instead of three.
    qkv = _mm(x, wqkv_ref[...]) + bqkv_ref[...]             # (N, 3D)
    q = qkv[:, 0 * d:1 * d]                                 # 128-aligned lane slices
    k = qkv[:, 1 * d:2 * d]
    v = qkv[:, 2 * d:3 * d]

    # Start the accumulator from the output-projection bias (hoisted broadcast).
    acc = jnp.broadcast_to(bo_ref[...], (n, d)).astype(jnp.float32)

    # Static Python loop over heads: static slices only, no head reshape /
    # transpose and no concat — head h contributes oh @ Wo[h*hd:(h+1)*hd, :].
    for h in range(num_heads):
        lo = h * head_dim
        qh = _layernorm(q[:, lo:lo + head_dim], eps)        # (N, hd)
        kh = _layernorm(k[:, lo:lo + head_dim], eps)        # (N, hd)
        vh = v[:, lo:lo + head_dim]                         # (N, hd)

        s = _mm(qh, kh, _NT) * jnp.float32(scale)           # (N, N)
        m = jnp.max(s, axis=-1, keepdims=True)
        p = jnp.exp(s - m)
        l = jnp.sum(p, axis=-1, keepdims=True)
        oh = _mm(p, vh) * pl.reciprocal(l, approx=False)    # (N, hd)  softmax(s) @ v

        acc = acc + _mm(oh, wo_ref[lo:lo + head_dim, :])    # (N, D), sublane-aligned slice

    out_ref[0] = acc


def attention_forward(x, params, *, head_dim: int = 64, eps: float = 1e-6):
    """x: (B, N, D) f32 -> (B, N, D) f32, matching Attention.forward(x) (no mask/rope)."""
    b, n, d = x.shape
    assert d % head_dim == 0, (d, head_dim)
    num_heads = d // head_dim
    scale = 1.0 / d                                         # module uses scale = 1/dim

    # Merge the three projection weights once (tiny HBM copy, outside the kernel).
    wqkv = jnp.concatenate([params["wq"], params["wk"], params["wv"]], axis=1)  # (D, 3D)
    bqkv = jnp.concatenate([params["bq"], params["bk"], params["bv"]], axis=1)  # (1, 3D)

    kernel = functools.partial(
        _attention_kernel,
        num_heads=num_heads, head_dim=head_dim, scale=scale, eps=eps,
    )

    full = lambda bi: (0, 0)
    return pl.pallas_call(
        kernel,
        out_shape=jax.ShapeDtypeStruct((b, n, d), jnp.float32),
        grid=(b,),
        in_specs=[
            pl.BlockSpec((1, n, d), lambda bi: (bi, 0, 0)),       # x, one batch per step
            pl.BlockSpec((d, 3 * d), full),                       # Wqkv
            pl.BlockSpec((1, 3 * d), full),                       # bqkv
            pl.BlockSpec((d, d), full),                           # Wo
            pl.BlockSpec((1, d), full),                           # bo
        ],
        out_specs=pl.BlockSpec((1, n, d), lambda bi: (bi, 0, 0)),
        compiler_params=pltpu.CompilerParams(
            dimension_semantics=("parallel",),                    # shard batch across TCs (v7x)
        ),
    )(x, wqkv, bqkv, params["wo"], params["bo"])


def _reference(x, params, *, head_dim: int = 64, eps: float = 1e-6):
    """Pure-JAX mirror of the PyTorch forward (rope=None, mask=None, dropout off)."""
    b, n, d = x.shape
    h = d // head_dim
    scale = 1.0 / d
    hp = _HIGHEST

    q = jnp.einsum("bnd,de->bne", x, params["wq"], precision=hp) + params["bq"]
    k = jnp.einsum("bnd,de->bne", x, params["wk"], precision=hp) + params["bk"]
    v = jnp.einsum("bnd,de->bne", x, params["wv"], precision=hp) + params["bv"]

    def split(t):
        return t.reshape(b, n, h, head_dim).transpose(0, 2, 1, 3)   # (B, H, N, hd)

    def ln(t):
        mu = t.mean(-1, keepdims=True)
        var = ((t - mu) ** 2).mean(-1, keepdims=True)
        return (t - mu) / jnp.sqrt(var + eps)

    qh, kh, vh = ln(split(q)), ln(split(k)), split(v)

    s = jnp.einsum("bhqd,bhkd->bhqk", qh, kh, precision=hp) * scale
    p = jax.nn.softmax(s, axis=-1)
    o = jnp.einsum("bhqk,bhkd->bhqd", p, vh, precision=hp)
    o = o.transpose(0, 2, 1, 3).reshape(b, n, d)
    return jnp.einsum("bnd,de->bne", o, params["wo"], precision=hp) + params["bo"]


if __name__ == "__main__":
    key = jax.random.PRNGKey(0)
    B, N, DIM, HEAD_DIM = 2, 16, 128, 64          # num_heads = 2, lane-dense D

    ks = jax.random.split(key, 9)
    winit = 1.0 / math.sqrt(DIM)
    # Weights stored as (in, out); converting from a torch nn.Linear would require W.T.
    params = {
        "wq": jax.random.normal(ks[0], (DIM, DIM), jnp.float32) * winit,
        "bq": jax.random.normal(ks[1], (1, DIM), jnp.float32) * 0.02,
        "wk": jax.random.normal(ks[2], (DIM, DIM), jnp.float32) * winit,
        "bk": jax.random.normal(ks[3], (1, DIM), jnp.float32) * 0.02,
        "wv": jax.random.normal(ks[4], (DIM, DIM), jnp.float32) * winit,
        "bv": jax.random.normal(ks[5], (1, DIM), jnp.float32) * 0.02,
        "wo": jax.random.normal(ks[6], (DIM, DIM), jnp.float32) * winit,
        "bo": jax.random.normal(ks[7], (1, DIM), jnp.float32) * 0.02,
    }
    x = jax.random.normal(ks[8], (B, N, DIM), jnp.float32)

    out = attention_forward(x, params, head_dim=HEAD_DIM)
    out = jax.block_until_ready(out)

    ref = _reference(x, params, head_dim=HEAD_DIM)
    assert out.shape == (B, N, DIM), out.shape
    max_err = float(jnp.max(jnp.abs(out - ref)))
    assert jnp.allclose(out, ref, atol=2e-4, rtol=2e-4), f"mismatch vs reference, max_err={max_err}"

    print("KERNEL_OK")
</pallas_src>

<mosaic_0001>
module attributes {stable_mosaic.version = 11 : i64} {
  func.func @_attention_kernel(%arg0: i32, %arg1: memref<1x16x128xf32, #tpu.memory_space<vmem>>, %arg2: memref<128x384xf32, #tpu.memory_space<vmem>>, %arg3: memref<1x384xf32, #tpu.memory_space<vmem>>, %arg4: memref<128x128xf32, #tpu.memory_space<vmem>>, %arg5: memref<1x128xf32, #tpu.memory_space<vmem>>, %arg6: memref<1x16x128xf32, #tpu.memory_space<vmem>>) attributes {dimension_semantics = [#tpu.dimension_semantics<parallel>], iteration_bounds = array<i64: 2>, scalar_prefetch = 0 : i64, scratch_operands = 0 : i64, tpu.core_type = #tpu.core_type<tc>, window_params = [{transform_indices = @transform_0, window_bounds = array<i64: 1, 16, 128>}, {pipeline_mode = #tpu.pipeline_mode<synchronous>, transform_indices = @transform_1, window_bounds = array<i64: 128, 384>}, {pipeline_mode = #tpu.pipeline_mode<synchronous>, transform_indices = @transform_2, window_bounds = array<i64: 1, 384>}, {pipeline_mode = #tpu.pipeline_mode<synchronous>, transform_indices = @transform_3, window_bounds = array<i64: 128, 128>}, {pipeline_mode = #tpu.pipeline_mode<synchronous>, transform_indices = @transform_4, window_bounds = array<i64: 1, 128>}, {transform_indices = @transform_5, window_bounds = array<i64: 1, 16, 128>}]} {
    %c0 = arith.constant 0 : index
    %c0_0 = arith.constant 0 : index
    %c0_1 = arith.constant 0 : index
    %0 = vector.load %arg1[%c0, %c0_0, %c0_1] : memref<1x16x128xf32, #tpu.memory_space<vmem>>, vector<1x16x128xf32>
    %1 = vector.shape_cast %0 : vector<1x16x128xf32> to vector<16x128xf32>
    %c0_2 = arith.constant 0 : index
    %c0_3 = arith.constant 0 : index
    %2 = vector.load %arg2[%c0_2, %c0_3] : memref<128x384xf32, #tpu.memory_space<vmem>>, vector<128x384xf32>
    %cst = arith.constant dense<0.000000e+00> : vector<16x384xf32>
    %3 = tpu.matmul %1, %2, %cst {dimension_numbers = #tpu.dot_dimension_numbers<[1], [0], [0], [1], [0, 0, 1, 1], [], []>, precision = #tpu.contract_precision<fp32>} : vector<16x128xf32>, vector<128x384xf32>, vector<16x384xf32> -> vector<16x384xf32>
    %c0_4 = arith.constant 0 : index
    %c0_5 = arith.constant 0 : index
    %4 = vector.load %arg3[%c0_4, %c0_5] : memref<1x384xf32, #tpu.memory_space<vmem>>, vector<1x384xf32>
    %5 = vector.broadcast %4 : vector<1x384xf32> to vector<16x384xf32>
    %6 = arith.addf %3, %5 : vector<16x384xf32>
    %7 = vector.extract_strided_slice %6 {offsets = [0, 0], sizes = [16, 128], strides = [1, 1]} : vector<16x384xf32> to vector<16x128xf32>
    %8 = vector.extract_strided_slice %6 {offsets = [0, 128], sizes = [16, 128], strides = [1, 1]} : vector<16x384xf32> to vector<16x128xf32>
    %9 = vector.extract_strided_slice %6 {offsets = [0, 256], sizes = [16, 128], strides = [1, 1]} : vector<16x384xf32> to vector<16x128xf32>
    %c0_6 = arith.constant 0 : index
    %c0_7 = arith.constant 0 : index
    %10 = vector.load %arg5[%c0_6, %c0_7] : memref<1x128xf32, #tpu.memory_space<vmem>>, vector<1x128xf32>
    %11 = vector.shape_cast %10 : vector<1x128xf32> to vector<1x128xf32>
    %12 = vector.broadcast %11 : vector<1x128xf32> to vector<16x128xf32>
    %13 = vector.extract_strided_slice %7 {offsets = [0, 0], sizes = [16, 64], strides = [1, 1]} : vector<16x128xf32> to vector<16x64xf32>
    %cst_8 = arith.constant dense<0.000000e+00> : vector<16xf32>
    %14 = vector.multi_reduction <add>, %13, %cst_8 [1] : vector<16x64xf32> to vector<16xf32>
    %15 = vector.shape_cast %14 : vector<16xf32> to vector<16x1xf32>
    %cst_9 = arith.constant 6.400000e+01 : f32
    %16 = vector.broadcast %cst_9 : f32 to vector<16x1xf32>
    %17 = arith.divf %15, %16 : vector<16x1xf32>
    %18 = vector.broadcast %17 : vector<16x1xf32> to vector<16x64xf32>
    %19 = arith.subf %13, %18 : vector<16x64xf32>
    %20 = arith.mulf %19, %19 : vector<16x64xf32>
    %cst_10 = arith.constant dense<0.000000e+00> : vector<16xf32>
    %21 = vector.multi_reduction <add>, %20, %cst_10 [1] : vector<16x64xf32> to vector<16xf32>
    %22 = vector.shape_cast %21 : vector<16xf32> to vector<16x1xf32>
    %cst_11 = arith.constant 6.400000e+01 : f32
    %23 = vector.broadcast %cst_11 : f32 to vector<16x1xf32>
    %24 = arith.divf %22, %23 : vector<16x1xf32>
    %cst_12 = arith.constant 9.99999997E-7 : f32
    %25 = vector.broadcast %cst_12 : f32 to vector<16x1xf32>
    %26 = arith.addf %24, %25 : vector<16x1xf32>
    %27 = math.rsqrt %26 : vector<16x1xf32>
    %28 = vector.broadcast %27 : vector<16x1xf32> to vector<16x64xf32>
    %29 = arith.mulf %19, %28 : vector<16x64xf32>
    %30 = vector.extract_strided_slice %8 {offsets = [0, 0], sizes = [16, 64], strides = [1, 1]} : vector<16x128xf32> to vector<16x64xf32>
    %cst_13 = arith.constant dense<0.000000e+00> : vector<16xf32>
    %31 = vector.multi_reduction <add>, %30, %cst_13 [1] : vector<16x64xf32> to vector<16xf32>
    %32 = vector.shape_cast %31 : vector<16xf32> to vector<16x1xf32>
    %cst_14 = arith.constant 6.400000e+01 : f32
    %33 = vector.broadcast %cst_14 : f32 to vector<16x1xf32>
    %34 = arith.divf %32, %33 : vector<16x1xf32>
    %35 = vector.broadcast %34 : vector<16x1xf32> to vector<16x64xf32>
    %36 = arith.subf %30, %35 : vector<16x64xf32>
    %37 = arith.mulf %36, %36 : vector<16x64xf32>
    %cst_15 = arith.constant dense<0.000000e+00> : vector<16xf32>
    %38 = vector.multi_reduction <add>, %37, %cst_15 [1] : vector<16x64xf32> to vector<16xf32>
    %39 = vector.shape_cast %38 : vector<16xf32> to vector<16x1xf32>
    %cst_16 = arith.constant 6.400000e+01 : f32
    %40 = vector.broadcast %cst_16 : f32 to vector<16x1xf32>
    %41 = arith.divf %39, %40 : vector<16x1xf32>
    %cst_17 = arith.constant 9.99999997E-7 : f32
    %42 = vector.broadcast %cst_17 : f32 to vector<16x1xf32>
    %43 = arith.addf %41, %42 : vector<16x1xf32>
    %44 = math.rsqrt %43 : vector<16x1xf32>
    %45 = vector.broadcast %44 : vector<16x1xf32> to vector<16x64xf32>
    %46 = arith.mulf %36, %45 : vector<16x64xf32>
    %47 = vector.extract_strided_slice %9 {offsets = [0, 0], sizes = [16, 64], strides = [1, 1]} : vector<16x128xf32> to vector<16x64xf32>
    %cst_18 = arith.constant dense<0.000000e+00> : vector<16x16xf32>
    %48 = tpu.matmul %29, %46, %cst_18 {dimension_numbers = #tpu.dot_dimension_numbers<[1], [1], [0], [0], [0, 0, 1, 0], [], []>, precision = #tpu.contract_precision<fp32>} : vector<16x64xf32>, vector<16x64xf32>, vector<16x16xf32> -> vector<16x16xf32>
    %cst_19 = arith.constant 7.812500e-03 : f32
    %49 = vector.broadcast %cst_19 : f32 to vector<16x16xf32>
    %50 = arith.mulf %48, %49 : vector<16x16xf32>
    %cst_20 = arith.constant dense<0xFF800000> : vector<16xf32>
    %51 = vector.multi_reduction <maximumf>, %50, %cst_20 [1] : vector<16x16xf32> to vector<16xf32>
    %52 = vector.shape_cast %51 : vector<16xf32> to vector<16x1xf32>
    %53 = vector.broadcast %52 : vector<16x1xf32> to vector<16x16xf32>
    %54 = arith.subf %50, %53 : vector<16x16xf32>
    %55 = math.exp %54 : vector<16x16xf32>
    %cst_21 = arith.constant dense<0.000000e+00> : vector<16xf32>
    %56 = vector.multi_reduction <add>, %55, %cst_21 [1] : vector<16x16xf32> to vector<16xf32>
    %57 = vector.shape_cast %56 : vector<16xf32> to vector<16x1xf32>
    %cst_22 = arith.constant dense<0.000000e+00> : vector<16x64xf32>
    %58 = tpu.matmul %55, %47, %cst_22 {dimension_numbers = #tpu.dot_dimension_numbers<[1], [0], [0], [1], [0, 0, 1, 1], [], []>, precision = #tpu.contract_precision<fp32>} : vector<16x16xf32>, vector<16x64xf32>, vector<16x64xf32> -> vector<16x64xf32>
    %59 = tpu.reciprocal %57 : vector<16x1xf32> -> vector<16x1xf32>
    %60 = vector.broadcast %59 : vector<16x1xf32> to vector<16x64xf32>
    %61 = arith.mulf %58, %60 : vector<16x64xf32>
    %c0_23 = arith.constant 0 : index
    %c0_24 = arith.constant 0 : index
    %62 = vector.load %arg4[%c0_23, %c0_24] : memref<128x128xf32, #tpu.memory_space<vmem>>, vector<64x128xf32>
    %cst_25 = arith.constant dense<0.000000e+00> : vector<16x128xf32>
    %63 = tpu.matmul %61, %62, %cst_25 {dimension_numbers = #tpu.dot_dimension_numbers<[1], [0], [0], [1], [0, 0, 1, 1], [], []>, precision = #tpu.contract_precision<fp32>} : vector<16x64xf32>, vector<64x128xf32>, vector<16x128xf32> -> vector<16x128xf32>
    %64 = arith.addf %12, %63 : vector<16x128xf32>
    %65 = vector.extract_strided_slice %7 {offsets = [0, 64], sizes = [16, 64], strides = [1, 1]} : vector<16x128xf32> to vector<16x64xf32>
    %cst_26 = arith.constant dense<0.000000e+00> : vector<16xf32>
    %66 = vector.multi_reduction <add>, %65, %cst_26 [1] : vector<16x64xf32> to vector<16xf32>
    %67 = vector.shape_cast %66 : vector<16xf32> to vector<16x1xf32>
    %cst_27 = arith.constant 6.400000e+01 : f32
    %68 = vector.broadcast %cst_27 : f32 to vector<16x1xf32>
    %69 = arith.divf %67, %68 : vector<16x1xf32>
    %70 = vector.broadcast %69 : vector<16x1xf32> to vector<16x64xf32>
    %71 = arith.subf %65, %70 : vector<16x64xf32>
    %72 = arith.mulf %71, %71 : vector<16x64xf32>
    %cst_28 = arith.constant dense<0.000000e+00> : vector<16xf32>
    %73 = vector.multi_reduction <add>, %72, %cst_28 [1] : vector<16x64xf32> to vector<16xf32>
    %74 = vector.shape_cast %73 : vector<16xf32> to vector<16x1xf32>
    %cst_29 = arith.constant 6.400000e+01 : f32
    %75 = vector.broadcast %cst_29 : f32 to vector<16x1xf32>
    %76 = arith.divf %74, %75 : vector<16x1xf32>
    %cst_30 = arith.constant 9.99999997E-7 : f32
    %77 = vector.broadcast %cst_30 : f32 to vector<16x1xf32>
    %78 = arith.addf %76, %77 : vector<16x1xf32>
    %79 = math.rsqrt %78 : vector<16x1xf32>
    %80 = vector.broadcast %79 : vector<16x1xf32> to vector<16x64xf32>
    %81 = arith.mulf %71, %80 : vector<16x64xf32>
    %82 = vector.extract_strided_slice %8 {offsets = [0, 64], sizes = [16, 64], strides = [1, 1]} : vector<16x128xf32> to vector<16x64xf32>
    %cst_31 = arith.constant dense<0.000000e+00> : vector<16xf32>
    %83 = vector.multi_reduction <add>, %82, %cst_31 [1] : vector<16x64xf32> to vector<16xf32>
    %84 = vector.shape_cast %83 : vector<16xf32> to vector<16x1xf32>
    %cst_32 = arith.constant 6.400000e+01 : f32
    %85 = vector.broadcast %cst_32 : f32 to vector<16x1xf32>
    %86 = arith.divf %84, %85 : vector<16x1xf32>
    %87 = vector.broadcast %86 : vector<16x1xf32> to vector<16x64xf32>
    %88 = arith.subf %82, %87 : vector<16x64xf32>
    %89 = arith.mulf %88, %88 : vector<16x64xf32>
    %cst_33 = arith.constant dense<0.000000e+00> : vector<16xf32>
    %90 = vector.multi_reduction <add>, %89, %cst_33 [1] : vector<16x64xf32> to vector<16xf32>
    %91 = vector.shape_cast %90 : vector<16xf32> to vector<16x1xf32>
    %cst_34 = arith.constant 6.400000e+01 : f32
    %92 = vector.broadcast %cst_34 : f32 to vector<16x1xf32>
    %93 = arith.divf %91, %92 : vector<16x1xf32>
    %cst_35 = arith.constant 9.99999997E-7 : f32
    %94 = vector.broadcast %cst_35 : f32 to vector<16x1xf32>
    %95 = arith.addf %93, %94 : vector<16x1xf32>
    %96 = math.rsqrt %95 : vector<16x1xf32>
    %97 = vector.broadcast %96 : vector<16x1xf32> to vector<16x64xf32>
    %98 = arith.mulf %88, %97 : vector<16x64xf32>
    %99 = vector.extract_strided_slice %9 {offsets = [0, 64], sizes = [16, 64], strides = [1, 1]} : vector<16x128xf32> to vector<16x64xf32>
    %cst_36 = arith.constant dense<0.000000e+00> : vector<16x16xf32>
    %100 = tpu.matmul %81, %98, %cst_36 {dimension_numbers = #tpu.dot_dimension_numbers<[1], [1], [0], [0], [0, 0, 1, 0], [], []>, precision = #tpu.contract_precision<fp32>} : vector<16x64xf32>, vector<16x64xf32>, vector<16x16xf32> -> vector<16x16xf32>
    %cst_37 = arith.constant 7.812500e-03 : f32
    %101 = vector.broadcast %cst_37 : f32 to vector<16x16xf32>
    %102 = arith.mulf %100, %101 : vector<16x16xf32>
    %cst_38 = arith.constant dense<0xFF800000> : vector<16xf32>
    %103 = vector.multi_reduction <maximumf>, %102, %cst_38 [1] : vector<16x16xf32> to vector<16xf32>
    %104 = vector.shape_cast %103 : vector<16xf32> to vector<16x1xf32>
    %105 = vector.broadcast %104 : vector<16x1xf32> to vector<16x16xf32>
    %106 = arith.subf %102, %105 : vector<16x16xf32>
    %107 = math.exp %106 : vector<16x16xf32>
    %cst_39 = arith.constant dense<0.000000e+00> : vector<16xf32>
    %108 = vector.multi_reduction <add>, %107, %cst_39 [1] : vector<16x16xf32> to vector<16xf32>
    %109 = vector.shape_cast %108 : vector<16xf32> to vector<16x1xf32>
    %cst_40 = arith.constant dense<0.000000e+00> : vector<16x64xf32>
    %110 = tpu.matmul %107, %99, %cst_40 {dimension_numbers = #tpu.dot_dimension_numbers<[1], [0], [0], [1], [0, 0, 1, 1], [], []>, precision = #tpu.contract_precision<fp32>} : vector<16x16xf32>, vector<16x64xf32>, vector<16x64xf32> -> vector<16x64xf32>
    %111 = tpu.reciprocal %109 : vector<16x1xf32> -> vector<16x1xf32>
    %112 = vector.broadcast %111 : vector<16x1xf32> to vector<16x64xf32>
    %113 = arith.mulf %110, %112 : vector<16x64xf32>
    %c64 = arith.constant 64 : index
    %c0_41 = arith.constant 0 : index
    %114 = vector.load %arg4[%c64, %c0_41] : memref<128x128xf32, #tpu.memory_space<vmem>>, vector<64x128xf32>
    %cst_42 = arith.constant dense<0.000000e+00> : vector<16x128xf32>
    %115 = tpu.matmul %113, %114, %cst_42 {dimension_numbers = #tpu.dot_dimension_numbers<[1], [0], [0], [1], [0, 0, 1, 1], [], []>, precision = #tpu.contract_precision<fp32>} : vector<16x64xf32>, vector<64x128xf32>, vector<16x128xf32> -> vector<16x128xf32>
    %116 = arith.addf %64, %115 : vector<16x128xf32>
    %c0_43 = arith.constant 0 : index
    %c0_44 = arith.constant 0 : index
    %c0_45 = arith.constant 0 : index
    %117 = vector.load %arg6[%c0_43, %c0_44, %c0_45] : memref<1x16x128xf32, #tpu.memory_space<vmem>>, vector<1x16x128xf32>
    %118 = vector.shape_cast %117 : vector<1x16x128xf32> to vector<16x128xf32>
    %119 = vector.shape_cast %116 : vector<16x128xf32> to vector<1x16x128xf32>
    tpu.vector_store %arg6[%c0_43, %c0_44, %c0_45], %119 {strides = array<i32>} : memref<1x16x128xf32, #tpu.memory_space<vmem>>, vector<1x16x128xf32>,
    return
  }
  func.func @transform_0(%arg0: i32) -> (i32, i32, i32) {
    %c0_i32 = arith.constant 0 : i32
    %c0_i32_0 = arith.constant 0 : i32
    %c0_i32_1 = arith.constant 0 : i32
    return %arg0, %c0_i32, %c0_i32_0 : i32, i32, i32
  }
  func.func @transform_1(%arg0: i32) -> (i32, i32) {
    %c0_i32 = arith.constant 0 : i32
    %c0_i32_0 = arith.constant 0 : i32
    %c0_i32_1 = arith.constant 0 : i32
    return %c0_i32, %c0_i32_0 : i32, i32
  }
  func.func @transform_2(%arg0: i32) -> (i32, i32) {
    %c0_i32 = arith.constant 0 : i32
    %c0_i32_0 = arith.constant 0 : i32
    %c0_i32_1 = arith.constant 0 : i32
    return %c0_i32, %c0_i32_0 : i32, i32
  }
  func.func @transform_3(%arg0: i32) -> (i32, i32) {
    %c0_i32 = arith.constant 0 : i32
    %c0_i32_0 = arith.constant 0 : i32
    %c0_i32_1 = arith.constant 0 : i32
    return %c0_i32, %c0_i32_0 : i32, i32
  }
  func.func @transform_4(%arg0: i32) -> (i32, i32) {
    %c0_i32 = arith.constant 0 : i32
    %c0_i32_0 = arith.constant 0 : i32
    %c0_i32_1 = arith.constant 0 : i32
    return %c0_i32, %c0_i32_0 : i32, i32
  }
  func.func @transform_5(%arg0: i32) -> (i32, i32, i32) {
    %c0_i32 = arith.constant 0 : i32
    %c0_i32_0 = arith.constant 0 : i32
    %c0_i32_1 = arith.constant 0 : i32
    return %arg0, %c0_i32, %c0_i32_0 : i32, i32, i32
  }
}

</mosaic_0001>

<bundles_post_ra>
// kernel: tpu_custom_call.1
= control target key start
LH: loop header
LB: loop body
LE: loop exit
PB: predicated region body
PF: predicated region fallthrough
CT: control target
= control target key end

     0   :  { %10 = vsyncpa [#allocation3], 0  ;;  %s8430_s0 = inlined_call_operand.hbm [shape: f32[2,16,128], index: 0, kind: input, shape index: {}]   ;;  %s8431_s1 = inlined_call_operand.hbm [shape: f32[128,384], index: 1, kind: input, shape index: {}]   ;;  %s8432_s2 = inlined_call_operand.vmem [shape: f32[1,384], index: 2, kind: input, shape index: {}]   ;;  %s8433_s3 = inlined_call_operand.hbm [shape: f32[128,128], index: 3, kind: input, shape index: {}]   ;;  %s8434_s4 = inlined_call_operand.vmem [shape: f32[1,128], index: 4, kind: input, shape index: {}]   ;;  %s8435_s5 = inlined_call_operand.hbm [shape: f32[2,16,128], index: 5, kind: output, shape index: {}]  }
   0x1   :  { %12 = vsyncpa [#allocation3 + $0x1], 0 }
   0x2   :  { %13 = vsyncpa [#allocation6], 0 }
   0x3   :  { %14 = vsyncpa [#allocation4], 0 }
   0x4   :  { %16 = vsyncpa [#allocation4 + $0x1], 0  ;;  %s6731_s18 = smov 0   ;;  %s6733_s19 = smov 0  }
   0x5   :  { %s6735_s20 = smov 0   ;;  %s6737_s21 = smov 0  }
   0x6 LB: > { %s6752_s22 = sadd.s32 4294967295, %s6687_s21   ;;  %s5481_s23 = sadd.s32 4294967294, %s6687_s21   ;;  %s6687_s21 = sphi %s6737_s21, %s8634_s21   ;;  %s6683_s20 = sphi %s6735_s20, %s8633_s20   ;;  %s6679_s19 = sphi %s6733_s19, %s8632_s19   ;;  %s6675_s18 = sphi %s6731_s18, %s8631_s18  }
   0x7   : > { %p42_p0 = scmp.ne.s32.totalorder %s6679_s19, %s6675_s18  ;;  %p8436_p1 = scmp.eq.s32.totalorder %s6752_s22, 0 }
   0x8   : > { %p156_p3 = scmp.eq.s32.totalorder %s5481_s23, 1  ;;  %p5482_p5 = scmp.ge.s32.totalorder %s6687_s21, 1 }
   0x9   : > { %p6761_p4 = por %p8436_p1, %p42_p0  ;;  %p163_p7 = scmp.lt.s32.totalorder %s6687_s21, 3 }
   0xa   : > { %p6766_p6 = por %p156_p3, %p42_p0  ;;  %s6689_s27 = smov [#allocation5]  }
   0xb   : > { %s8516_s24 = scalar_select %p6761_p4, 1, 0 }
   0xc   : > { %s8517_s25 = scalar_select %p6766_p6, 1, 0 }
   0xd   : > { %p6771_p8 = pnand %p5482_p5, %p163_p7  ;;  %s175_s28 = sshll.u32 %s6689_s27, 4  ;;  %s176_s28 = int_to_ptr.vmem [resolvable:$true] %s175_s28 }
   0xe   : > { %s6690_s30 = smov [#allocation7]   ;;  %s6550_s7 = scalar_lea.vmem %s176_s28, 6144 }
   0xf   : > { %s8518_s26 = scalar_select %p6771_p8, 1, 0 }
  0x10   : > { %p6444_p9 = pneg %p6771_p8  ;;  %s191_s6 = sshll.u32 %s6690_s30, 4  ;;  %s192_s6 = int_to_ptr.vmem [resolvable:$true] %s191_s6 }
  0x11   : > { %p6551_p13 = scmp.ne.s32.totalorder %s176_s28, %s6550_s7  ;;  %p6558_p5 = scmp.lt.s32.totalorder %s176_s28, %s176_s28 }
  0x12   : > { %p6780_p11 = pnand %p6444_p9, %p8436_p1  ;;  %p6559_p7 = scmp.lt.s32.totalorder %s6550_s7, %s6550_s7 }
  0x14   : > { %p6541_p12 = pneg %p6780_p11  ;;  %p6560_p10 = por %p6559_p7, %p6558_p5 }
  0x16   : > { %p6553_p0 = pnand %p6551_p13, %p6541_p12 }
  0x18   : > { %p6554_p3 = pneg %p6553_p0 }
  0x1a   : > { %p6561_p9 = pnand %p6560_p10, %p6554_p3 }
  0x1c   : > { %6564 = shalt.err (!%p6561_p9)
}
  0x1d   : > { %s6691_s8 = smov 384   ;;  %s6692_s9 = smov 24  }
  0x1e   : > { %6447 = dma.hbm_to_vmem [thread:$0]  (!%p6780_p11), %s8431_s1, 6144, %s176_s28, [#allocation6], %s6691_s8, %s6691_s8, %s6692_s9  }
  0x1f   : > { %s6576_s12 = scalar_lea.vmem %s192_s6, 2048  ;;  %p6584_p2 = scmp.lt.s32.totalorder %s192_s6, %s192_s6 }
  0x20   : > { %p6577_p1 = scmp.ne.s32.totalorder %s192_s6, %s6576_s12  ;;  %p6585_p6 = scmp.lt.s32.totalorder %s6576_s12, %s6576_s12 }
  0x22   : > { %p6579_p13 = pnand %p6577_p1, %p6541_p12  ;;  %p6586_p5 = por %p6585_p6, %p6584_p2 }
  0x24   : > { %p6580_p0 = pneg %p6579_p13 }
  0x26   : > { %p6587_p10 = pnand %p6586_p5, %p6580_p0 }
  0x28   : > { %6590 = shalt.err (!%p6587_p10)
}
  0x29   : > { %s8437_s13 = smov 128   ;;  %s6694_s14 = smov 8  }
  0x2a   : > { %6450 = dma.hbm_to_vmem [thread:$0]  (!%p6780_p11), %s8433_s3, 2048, %s192_s6, [#allocation6], %s8437_s13, %s8437_s13, %s6694_s14  }
  0x2b   : > { %s6806_s17 = sadd.s32 1, %s6687_s21   ;;  %s29_s27 = sadd.s32 1, %s6683_s20 }
  0x2c   : > { %s26_s23 = ssub.s32 %s6687_s21, %s6806_s17  ;;  %p36_p2 = scmp.ne.s32.totalorder %s6683_s20, %s6679_s19 }
  0x2d   : > { %p27_p1 = scmp.eq.s32.totalorder %s26_s23, 0  ;;  %p37_p6 = scmp.eq.s32.totalorder %s6687_s21, 0 }
  0x2e   : > { %p8520_p3 = scmp.eq.s32.totalorder %s6752_s22, 1  ;;  %p6461_p9 = scmp.lt.s32.totalorder %s6687_s21, 2 }
  0x2f   : > { %s6815_s28 = scalar_select %p27_p1, %s6683_s20, %s29_s27  }
  0x30   : > { %p38_p12 = por %p37_p6, %p36_p2  ;;  %p6819_p7 = por %p8520_p3, %p36_p2 }
  0x31   : > { %s208_s30 = sand.u32 1, %s6683_s20   ;;  %s5500_s6 = sshll.u32 %s6687_s21, 8 }
  0x32   : > { %s8521_s29 = scalar_select %p6819_p7, 1, 0 }
  0x33   : > { %s5486_s7 = sshll.u32 %s208_s30, 4  ;;  %s6829_s10 = scalar_lea.hbm %s8430_s0, %s5500_s6 }
  0x34   : > { %s212_s11 = scalar_lea.vmem [#allocation2], %s5486_s7  ;;  %p6833_p11 = pnand %p6461_p9, %p38_p12 }
  0x35   : > { %s219_s12 = sshll.u32 %s212_s11, 4  ;;  %s6837_s16 = scalar_lea.sflag [#allocation3], %s208_s30  ;;  %s6831_s12 = int_to_ptr.vmem [resolvable:$true] %s219_s12 }
  0x36   : > { %s6591_s23 = scalar_lea.hbm %s6829_s10, 256  ;;  %p6593_p0 = pneg %p6833_p11 }
  0x37   : > { %p6592_p13 = scmp.ne.s32.totalorder %s6829_s10, %s6591_s23  ;;  %s6596_s7 = scalar_lea.hbm %s8430_s0, 512 }
  0x38   : > { %p6597_p1 = scmp.lt.s32.totalorder %s6829_s10, %s8430_s0  ;;  %p6598_p2 = scmp.lt.s32.totalorder %s6596_s7, %s6591_s23 }
  0x39   : > { %p6594_p5 = pnand %p6593_p0, %p6592_p13 }
  0x3a   : > { %p6599_p6 = por %p6598_p2, %p6597_p1 }
  0x3b   : > { %p6595_p10 = pneg %p6594_p5 }
  0x3d   : > { %p6600_p12 = pnand %p6599_p6, %p6595_p10 }
  0x3f   : > { %6603 = shalt.err (!%p6600_p12)
}
  0x40   : > { %s6604_s30 = scalar_lea.vmem %s6831_s12, 256  ;;  %s6695_s11 = smov [#allocation2]  }
  0x41   : > { %p6605_p3 = scmp.ne.s32.totalorder %s6831_s12, %s6604_s30  ;;  %s6609_s13 = sshll.u32 %s6695_s11, 4  ;;  %s6610_s13 = int_to_ptr.vmem [resolvable:$false] %s6609_s13 }
  0x42   : > { %s6611_s27 = scalar_lea.vmem %s6610_s13, 512  ;;  %p6612_p5 = scmp.lt.s32.totalorder %s6831_s12, %s6610_s13 }
  0x43   : > { %p6607_p9 = pnand %p6605_p3, %p6593_p0  ;;  %p6613_p7 = scmp.lt.s32.totalorder %s6611_s27, %s6604_s30 }
  0x45   : > { %p6608_p13 = pneg %p6607_p9  ;;  %p6614_p4 = por %p6613_p7, %p6612_p5 }
  0x47   : > { %p6615_p8 = pnand %p6614_p4, %p6608_p13 }
  0x49   : > { %6618 = shalt.err (!%p6615_p8)
}
  0x4a   : > { %s8523_s23 = smov 128   ;;  %p8524_p0 = scmp.ne.s32.totalorder %s8518_s26, 0 }
  0x4b   : > { %6454 = dma.hbm_to_vmem [thread:$0]  (!%p6833_p11), %s6829_s10, 256, %s6831_s12, %s6837_s16, %s8523_s23, %s8523_s23, %s6694_s14  }
  0x4c   : > { %231 = sbr.rel (%p8524_p0) target bundleno = 2502 (0x9c6), region = 40 }
  0x51   : > { %s6864_s6 = sand.u32 1, %s6679_s19   ;;  %p8525_p4 = scmp.ne.s32.totalorder %s8516_s24, 0 }
  0x52   : > { %s5490_s13 = sshll.u32 %s6864_s6, 4  ;;  %s234_s7 = scalar_lea.sflag [#allocation3], %s6864_s6 }
  0x53   : > { %s6870_s15 = scalar_lea.vmem [#allocation2], %s5490_s13 }
  0x54   : > { %6662 = dma.done.wait (%p8525_p4), %s234_s7, 256  }
  0x55   : > { %6664 = vsyncadd (%p8525_p4), %s234_s7, 4294967040  ;;  %p8526_p8 = scmp.eq.s32.totalorder %s6752_s22, 0 }
  0x57   : > { %6666 = dma.done.wait (%p8526_p8), [#allocation6], 8192   ;;  %p8527_p7 = pmov %p8526_p8 }
  0x58   : > { %v8455_v0 = vmov 0.0   ;;  %v320_v1 = vld [vmem:[#allocation5 + $0x170] sm:$0xff]  ;;  %v319_v2 = vld [vmem:[#allocation5 + $0x168] sm:$0xff]  ;;  %v317_v3 = vld [vmem:[#allocation5 + $0x158] sm:$0xff]  ;;  %vm1934_vm0 = vcmask 523264   ;;  %vm2504_vm1 = vcmask 130048  }
  0x59   : > { %6668 = vsyncadd (%p8527_p7), [#allocation6], 4294959104  ;;  %435 = vmatprep.mubr.f32.mxu0 %v8455_v0  ;;  %682 = vmatprep.mubr.f32.mxu1 %v8455_v0  ;;  %v6882_v4 = vand.u32 4294901760, %v320_v1  ;;  %v6884_v5 = vand.u32 4294901760, %v319_v2  ;;  %v6886_v6 = vand.u32 4294901760, %v317_v3  ;;  %v316_v7 = vld [vmem:[#allocation5 + $0x150] sm:$0xff] }
  0x5a   : > { %v314_v8 = vld [vmem:[#allocation5 + $0x140] sm:$0xff]  ;;  %v313_v9 = vld [vmem:[#allocation5 + $0x138] sm:$0xff]  ;;  %v6888_v10 = vand.u32 4294901760, %v316_v7  ;;  %v311_v13 = vld [vmem:[#allocation5 + $0x128] sm:$0xff]  ;;  %s6697_s14 = smov 64   ;;  %s271_s16 = scalar_lea.vmem [#allocation8], %s5490_s13 }
  0x5b   : > { %v6890_v11 = vand.u32 4294901760, %v314_v8  ;;  %v6892_v12 = vand.u32 4294901760, %v313_v9  ;;  %v310_v14 = vld [vmem:[#allocation5 + $0x120] sm:$0xff]  ;;  %v308_v15 = vld [vmem:[#allocation5 + $0x110] sm:$0xff]  ;;  %340 = vmatprep.subr.mxu0 %v6882_v4  ;;  %v6895_v16 = vand.u32 4294901760, %v311_v13  ;;  %v6902_v19 = vsub.f32 %v320_v1, %v6882_v4  ;;  %v6904_v20 = vld [vmem:[#allocation5 + $0x108] sm:$0xff] }
  0x5c   : > { %v6897_v17 = vand.u32 4294901760, %v310_v14  ;;  %v6899_v18 = vand.u32 4294901760, %v308_v15  ;;  %v6906_v21 = vld [vmem:[#allocation5 + $0xf8] sm:$0xff]  ;;  %v6908_v22 = vld [vmem:[#allocation5 + $0xf0] sm:$0xff]  ;;  %342 = vmatpush1.msra.mxu0 %v6884_v5  ;;  %v6912_v23 = vand.u32 4294901760, %v6904_v20  ;;  %v6915_v24 = vsub.f32 %v319_v2, %v6884_v5  ;;  %v6923_v27 = vld [vmem:[#allocation5 + $0xe0] sm:$0xff] }
  0x5d   : > { %v6918_v25 = vand.u32 4294901760, %v6906_v21  ;;  %v6921_v26 = vsub.f32 %v317_v3, %v6886_v6  ;;  %v6925_v28 = vld [vmem:[#allocation5 + $0xd8] sm:$0xff]  ;;  %v6927_v29 = vld [vmem:[#allocation5 + $0xc8] sm:$0xff]  ;;  %344 = vmatprep.subr.mxu0 %v6886_v6  ;;  %v8453_v30 = vand.u32 4294901760, %v6902_v19  ;;  %v6932_v31 = vand.u32 4294901760, %v6908_v22  ;;  %v6949_v38 = vld [vmem:[#allocation5 + $0xc0] sm:$0xff] }
  0x5e   : > { %v6935_v32 = vsub.f32 %v316_v7, %v6888_v10  ;;  %v6938_v33 = vand.u32 4294901760, %v6923_v27  ;;  %346 = vmatpush1.msra.mxu0 %v6888_v10  ;;  %v8452_v34 = vand.u32 4294901760, %v6915_v24  ;;  %v6944_v36 = vsub.f32 %v314_v8, %v6890_v11  ;;  %v6973_v47 = vld [vmem:[#allocation5 + $0xb0] sm:$0xff]  ;;  %v6983_v52 = vld [vmem:[#allocation5 + $0xa8] sm:$0xff]  ;;  %v6990_v57 = vld [vmem:[#allocation5 + $0x98] sm:$0xff]  ;;  %s5389_s8 = sshll.u32 %s271_s16, 4  ;;  %s8382_s8 = int_to_ptr.vmem [resolvable:$true] %s5389_s8 }
  0x5f   : > { %8528 = vst [vmem:[#allocation12_spill] sm:$0xff] %v6932_v31  ;;  %v8450_v35 = vand.u32 4294901760, %v6921_v26  ;;  %v6947_v37 = vand.u32 4294901760, %v6925_v28  ;;  %348 = vmatprep.subr.mxu0 %v6890_v11  ;;  %v461_v39 = vsub.f32 %v6902_v19, %v8453_v30  ;;  %v6957_v41 = vsub.f32 %v313_v9, %v6892_v12  ;;  %v7002_v62 = vld [vmem:[#allocation5 + $0x90] sm:$0xff]  ;;  %v7014_v7 = vld [vmem:[#allocation5 + $0x80] sm:$0xff]  ;;  %s5501_s9 = sshll.u32 %s6752_s22, 8 }
  0x60   : > { %8529 = vst [vmem:[#allocation13_spill] sm:$0xff] %v6938_v33  ;;  %v8448_v40 = vand.u32 4294901760, %v6935_v32  ;;  %v6960_v42 = vand.u32 4294901760, %v6927_v29  ;;  %350 = vmatpush1.msra.mxu0 %v6892_v12  ;;  %v467_v43 = vsub.f32 %v6915_v24, %v8452_v34  ;;  %v8447_v45 = vand.u32 4294901760, %v6944_v36  ;;  %v7115_v34 = vld [vmem:[#allocation5 + $0x30] sm:$0xff]  ;;  %s8387_s27 = scalar_lea.hbm %s8435_s5, %s5501_s9  ;;  %s5376_s23 = scalar_lea.sflag [#allocation4], %s6864_s6 }
  0x61   : > { %8530 = vst [vmem:[#allocation14_spill] sm:$0xff] %v6947_v37  ;;  %v473_v44 = vsub.f32 %v6921_v26, %v8450_v35  ;;  %v6971_v46 = vsub.f32 %v311_v13, %v6895_v16  ;;  %352 = vmatprep.subr.mxu0 %v6895_v16  ;;  %v462_v48 = vand.u32 4294901760, %v461_v39  ;;  %v8445_v50 = vand.u32 4294901760, %v6957_v41  ;;  %v7105_v35 = vld [vmem:[#allocation5 + $0x38] sm:$0xff]  ;;  %s6619_s13 = scalar_lea.vmem %s8382_s8, 256  ;;  %p8628_p10 = scmp.ne.s32.totalorder %s8521_s29, 0 }
  0x62   : > { %8531 = vst [vmem:[#allocation15_spill] sm:$0xff] %v6960_v42  ;;  %v479_v49 = vsub.f32 %v6935_v32, %v8448_v40  ;;  %v6981_v51 = vand.u32 4294901760, %v6949_v38  ;;  %354 = vmatpush1.msra.mxu0 %v6897_v17  ;;  %v468_v53 = vand.u32 4294901760, %v467_v43  ;;  %v485_v55 = vsub.f32 %v6944_v36, %v8447_v45  ;;  %v7092_v45 = vld [vmem:[#allocation5 + $0x48] sm:$0xff]  ;;  %p6620_p11 = scmp.ne.s32.totalorder %s8382_s8, %s6619_s13  ;;  %s6698_s22 = smov [#allocation8]  }
  0x63   : > { %v474_v54 = vand.u32 4294901760, %v473_v44  ;;  %v8443_v56 = vand.u32 4294901760, %v6971_v46  ;;  %356 = vmatprep.subr.mxu0 %v6899_v18  ;;  %463 = vmatprep.subr.mxu1 %v462_v48  ;;  %v491_v59 = vsub.f32 %v6957_v41, %v8445_v50  ;;  %v6997_v60 = vsub.f32 %v310_v14, %v6897_v17  ;;  %s6623_s7 = sshll.u32 %s6698_s22, 4  ;;  %s6624_s7 = int_to_ptr.vmem [resolvable:$false] %s6623_s7 }
  0x64   : > { %8532 = vst [vmem:[#allocation16_spill] sm:$0xff] %v6981_v51  ;;  %v480_v58 = vand.u32 4294901760, %v479_v49  ;;  %v7000_v61 = vand.u32 4294901760, %v6973_v47  ;;  %358 = vmatpush1.msra.mxu0 %v6912_v23  ;;  %469 = vmatpush1.msra.mxu1 %v468_v53  ;;  %v486_v63 = vand.u32 4294901760, %v485_v55  ;;  %v7009_v2 = vsub.f32 %v308_v15, %v6899_v18  ;;  %v7025_v15 = vld [vmem:[#allocation5 + $0x78] sm:$0xff]  ;;  %p6621_p1 = pnand %p6620_p11, %p8628_p10  ;;  %p6626_p6 = scmp.lt.s32.totalorder %s8382_s8, %s6624_s7 }
  0x65   : > { %v497_v1 = vsub.f32 %v6971_v46, %v8443_v56  ;;  %v7012_v3 = vand.u32 4294901760, %v6983_v52  ;;  %360 = vmatprep.subr.mxu0 %v6918_v25  ;;  %475 = vmatprep.subr.mxu1 %v474_v54  ;;  %v492_v8 = vand.u32 4294901760, %v491_v59  ;;  %v8442_v9 = vand.u32 4294901760, %v6997_v60 }
  0x66   : > { %8533 = vst [vmem:[#allocation17_spill] sm:$0xff] %v7000_v61  ;;  %v7020_v13 = vsub.f32 %v6904_v20, %v6912_v23  ;;  %v7023_v14 = vand.u32 4294901760, %v6990_v57  ;;  %362 = vmatpush1.msra.mxu0 %v6932_v31  ;;  %481 = vmatpush1.msra.mxu1 %v480_v58  ;;  %v8441_v43 = vand.u32 4294901760, %v7009_v2  ;;  %v7031_v44 = vsub.f32 %v6906_v21, %v6918_v25  ;;  %v7048_v21 = vld [vmem:[#allocation5 + $0x68] sm:$0xff]  ;;  %p6622_p2 = pneg %p6621_p1 }
  0x67   : > { %8534 = vst [vmem:[#allocation18_spill] sm:$0xff] %v7012_v3  ;;  %v498_v39 = vand.u32 4294901760, %v497_v1  ;;  %v7034_v48 = vand.u32 4294901760, %v7002_v62  ;;  %364 = vmatprep.subr.mxu0 %v6938_v33  ;;  %487 = vmatprep.subr.mxu1 %v486_v63  ;;  %v503_v20 = vsub.f32 %v6997_v60, %v8442_v9  ;;  %v7043_v53 = vsub.f32 %v6908_v22, %v6932_v31  ;;  %v7071_v9 = vld [vmem:[#allocation5 + $0x60] sm:$0xff] }
  0x68   : > { %8535 = vst [vmem:[#allocation19_spill] sm:$0xff] %v7023_v14  ;;  %v8444_v49 = vand.u32 4294901760, %v7020_v13  ;;  %v7046_v54 = vand.u32 4294901760, %v7014_v7  ;;  %366 = vmatpush1.msra.mxu0 %v6947_v37  ;;  %493 = vmatpush1.msra.mxu1 %v492_v8  ;;  %v509_v55 = vsub.f32 %v7009_v2, %v8441_v43  ;;  %v8446_v58 = vand.u32 4294901760, %v7031_v44 }
  0x69   : > { %8536 = vst [vmem:[#allocation20_spill] sm:$0xff] %v7034_v48  ;;  %v7057_v59 = vsub.f32 %v6923_v27, %v6938_v33  ;;  %v7060_v22 = vand.u32 4294901760, %v7025_v15  ;;  %368 = vmatprep.subr.mxu0 %v6960_v42  ;;  %499 = vmatprep.subr.mxu1 %v498_v39  ;;  %v504_v63 = vand.u32 4294901760, %v503_v20  ;;  %v8449_v8 = vand.u32 4294901760, %v7043_v53  ;;  %v272_v33 = vld [vmem:[%s6870_s15] sm:$0xff] }
  0x6a   : > { %8537 = vst [vmem:[#allocation21_spill] sm:$0xff] %v7046_v54  ;;  %v515_v1 = vsub.f32 %v7020_v13, %v8444_v49  ;;  %v7069_v43 = vsub.f32 %v6925_v28, %v6947_v37  ;;  %370 = vmatpush1.msra.mxu0 %v6981_v51  ;;  %v510_v27 = vand.u32 4294901760, %v509_v55  ;;  %v521_v39 = vsub.f32 %v7031_v44, %v8446_v58  ;;  %v7081_v49 = vld [vmem:[#allocation5 + $0x50] sm:$0xff] }
  0x6b   : > { %8538 = vst [vmem:[#allocation22_spill] sm:$0xff] %v7060_v22  ;;  %v8451_v20 = vand.u32 4294901760, %v7057_v59  ;;  %v7079_v56 = vand.u32 4294901760, %v7048_v21  ;;  %505 = vmatpush1.msra.mxu1 %v504_v63  ;;  %372 = vmatprep.subr.mxu0 %v7000_v61  ;;  %v527_v50 = vsub.f32 %v7043_v53, %v8449_v8  ;;  %v7090_v58 = vsub.f32 %v6927_v29, %v6960_v42 }
  0x6c   : > { %v516_v28 = vand.u32 4294901760, %v515_v1  ;;  %v8454_v55 = vand.u32 4294901760, %v7069_v43  ;;  %511 = vmatprep.subr.mxu1 %v510_v27  ;;  %374 = vmatpush1.msra.mxu0 %v7012_v3  ;;  %v522_v40 = vand.u32 4294901760, %v521_v39  ;;  %v7099_v1 = vand.u32 4294901760, %v7071_v9 }
  0x6d   : > { %8539 = vst [vmem:[#allocation23_spill] sm:$0xff] %v7079_v56  ;;  %v533_v63 = vsub.f32 %v7057_v59, %v8451_v20  ;;  %v7103_v8 = vsub.f32 %v6949_v38, %v6981_v51  ;;  %376 = vmatprep.subr.mxu0 %v7023_v14  ;;  %v528_v29 = vand.u32 4294901760, %v527_v50  ;;  %v8459_v39 = vand.u32 4294901760, %v7090_v58 }
  0x6e   : > { %517 = vmatpush1.msra.mxu1 %v516_v28  ;;  %v539_v27 = vsub.f32 %v7069_v43, %v8454_v55  ;;  %v7113_v20 = vand.u32 4294901760, %v7081_v49  ;;  %378 = vmatpush1.msra.mxu0 %v7034_v48  ;;  %v7121_v50 = vsub.f32 %v6973_v47, %v7000_v61  ;;  %v7124_v30 = vand.u32 4294901760, %v7092_v45  ;;  %v7126_v55 = vld [vmem:[#allocation5 + $0x20] sm:$0xff] }
  0x6f   : > { %523 = vmatprep.subr.mxu1 %v522_v40  ;;  %v534_v38 = vand.u32 4294901760, %v533_v63  ;;  %v8462_v28 = vand.u32 4294901760, %v7103_v8  ;;  %380 = vmatprep.subr.mxu0 %v7046_v54  ;;  %v545_v40 = vsub.f32 %v7090_v58, %v8459_v39  ;;  %v7134_v63 = vsub.f32 %v6983_v52, %v7012_v3  ;;  %v7151_v52 = vld [vmem:[#allocation5 + $0x18] sm:$0xff] }
  0x70   : > { %8540 = vst [vmem:[#allocation24_spill] sm:$0xff] %v7113_v20  ;;  %8541 = vst [vmem:[#allocation25_spill] sm:$0xff] %v7124_v30  ;;  %529 = vmatpush1.msra.mxu1 %v528_v29  ;;  %v540_v0 = vand.u32 4294901760, %v539_v27  ;;  %v7137_v47 = vand.u32 4294901760, %v7105_v35  ;;  %382 = vmatpush1.msra.mxu0 %v7060_v22  ;;  %v7146_v61 = vsub.f32 %v6990_v57, %v7023_v14  ;;  %v7149_v39 = vand.u32 4294901760, %v7115_v34  ;;  %v7162_v57 = vld [vmem:[#allocation5 + $0x8] sm:$0xff] }
  0x71   : > { %535 = vmatprep.subr.mxu1 %v534_v38  ;;  %v551_v29 = vsub.f32 %v7103_v8, %v8462_v28  ;;  %384 = vmatprep.subr.mxu0 %v7079_v56  ;;  %v546_v38 = vand.u32 4294901760, %v545_v40  ;;  %v7157_v28 = vsub.f32 %v7002_v62, %v7034_v48  ;;  %v7160_v27 = vand.u32 4294901760, %v7126_v55  ;;  %v7185_v40 = vld [vmem:[#allocation5] sm:$0xff] }
  0x72   : > { %8542 = vst [vmem:[#allocation26_spill] sm:$0xff] %v7137_v47  ;;  %8543 = vst [vmem:[#allocation27_spill] sm:$0xff] %v7149_v39  ;;  %541 = vmatpush1.msra.mxu1 %v540_v0  ;;  %386 = vmatpush1.msra.mxu0 %v7099_v1  ;;  %v8545_v51 = vand.u32 4294901760, %v7121_v50  ;;  %v7171_v3 = vsub.f32 %v7014_v7, %v7046_v54  ;;  %v8546_v62 = vand.u32 4294901760, %v7134_v63  ;;  %v7179_v42 = vand.u32 4294901760, %v7151_v52 }
  0x73   : > { %8544 = vst [vmem:[#allocation28_spill] sm:$0xff] %v7160_v27  ;;  %v552_v14 = vand.u32 4294901760, %v551_v29  ;;  %547 = vmatprep.subr.mxu1 %v546_v38  ;;  %388 = vmatprep.subr.mxu0 %v7113_v20  ;;  %v8547_v38 = vand.u32 4294901760, %v7146_v61  ;;  %v7193_v29 = vand.u32 4294901760, %v7162_v57  ;;  %v7210_v31 = vand.u32 4294901760, %v7185_v40 }
  0x74   : > { %v557_v0 = vsub.f32 %v7121_v50, %v8545_v51  ;;  %v563_v48 = vsub.f32 %v7134_v63, %v8546_v62  ;;  %v7183_v51 = vsub.f32 %v7025_v15, %v7060_v22  ;;  %390 = vmatpush1.msra.mxu0 %v7124_v30  ;;  %v8481_v54 = vand.u32 4294901760, %v7171_v3 }
  0x75   : > { %553 = vmatpush1.msra.mxu1 %v552_v14  ;;  %v569_v62 = vsub.f32 %v7146_v61, %v8547_v38  ;;  %392 = vmatprep.subr.mxu0 %v7137_v47  ;;  %v8548_v15 = vand.u32 4294901760, %v7157_v28 }
  0x76   : > { %v558_v7 = vand.u32 4294901760, %v557_v0  ;;  %v564_v37 = vand.u32 4294901760, %v563_v48  ;;  %v7202_v0 = vsub.f32 %v7048_v21, %v7079_v56  ;;  %394 = vmatpush1.msra.mxu0 %v7149_v39  ;;  %v581_v48 = vsub.f32 %v7171_v3, %v8481_v54 }
  0x77   : > { %v575_v22 = vsub.f32 %v7157_v28, %v8548_v15  ;;  %v570_v38 = vand.u32 4294901760, %v569_v62  ;;  %v7214_v15 = vsub.f32 %v7071_v9, %v7099_v1  ;;  %396 = vmatprep.subr.mxu0 %v7160_v27  ;;  %v8549_v21 = vand.u32 4294901760, %v7183_v51 }
  0x78   : > { %559 = vmatprep.subr.mxu1 %v558_v7  ;;  %v8484_v62 = vand.u32 4294901760, %v7202_v0  ;;  %v7223_v54 = vsub.f32 %v7081_v49, %v7113_v20  ;;  %v582_v56 = vand.u32 4294901760, %v581_v48  ;;  %398 = vmatpush1.msra.mxu0 %v7179_v42  ;;  %v7240_v48 = vsub.f32 %v7105_v35, %v7137_v47 }
  0x79   : > { %565 = vmatpush1.msra.mxu1 %v564_v37  ;;  %v576_v14 = vand.u32 4294901760, %v575_v22  ;;  %v587_v7 = vsub.f32 %v7183_v51, %v8549_v21  ;;  %v8487_v9 = vand.u32 4294901760, %v7214_v15  ;;  %v7227_v37 = vand.u32 4294901760, %v272_v33  ;;  %400 = vmatprep.subr.mxu0 %v7193_v29 }
  0x7a   : > { %571 = vmatprep.subr.mxu1 %v570_v38  ;;  %v7231_v22 = vsub.f32 %v7092_v45, %v7124_v30  ;;  %v593_v49 = vsub.f32 %v7202_v0, %v8484_v62  ;;  %402 = vmatpush1.msra.mxu0 %v7210_v31  ;;  %v7252_v62 = vsub.f32 %v7115_v34, %v7149_v39  ;;  %v8552_v35 = vand.u32 4294901760, %v7223_v54 }
  0x7b   : > { %8550 = vst [vmem:[#allocation29_spill] sm:$0xff] %v7227_v37  ;;  %577 = vmatpush1.msra.mxu1 %v576_v14  ;;  %v588_v21 = vand.u32 4294901760, %v587_v7  ;;  %v599_v45 = vsub.f32 %v7214_v15, %v8487_v9  ;;  %v7247_v14 = vsub.f32 %v272_v33, %v7227_v37  ;;  %699 = vmatprep.subr.mxu0 %v6902_v19  ;;  %v8494_v47 = vand.u32 4294901760, %v7240_v48 }
  0x7c   : > { %583 = vmatprep.subr.mxu1 %v582_v56  ;;  %v594_v38 = vand.u32 4294901760, %v593_v49  ;;  %v605_v56 = vsub.f32 %v7223_v54, %v8552_v35  ;;  %v7261_v33 = vsub.f32 %v7126_v55, %v7160_v27  ;;  %v8554_v34 = vand.u32 4294901760, %v7231_v22 }
  0x7d   : > { %8551 = vst [vmem:[#allocation30_spill] sm:$0xff] %v7247_v14  ;;  %589 = vmatpush1.msra.mxu1 %v588_v21  ;;  %v600_v9 = vand.u32 4294901760, %v599_v45  ;;  %v7264_v7 = vand.u32 4294901760, %v7247_v14  ;;  %v8495_v49 = vand.u32 4294901760, %v7252_v62  ;;  %v617_v39 = vsub.f32 %v7240_v48, %v8494_v47 }
  0x7e   : > { %v611_v21 = vsub.f32 %v7231_v22, %v8554_v34  ;;  %595 = vmatprep.subr.mxu1 %v594_v38  ;;  %v606_v35 = vand.u32 4294901760, %v605_v56  ;;  %v8501_v30 = vand.u32 4294901760, %v7261_v33  ;;  %v7276_v55 = vsub.f32 %v7151_v52, %v7179_v42 }
  0x7f   : > { %8553 = vst [vmem:[#allocation31_spill] sm:$0xff] %v7264_v7  ;;  %601 = vmatpush1.msra.mxu1 %v600_v9  ;;  %v439_v45 = vsub.f32 %v7247_v14, %v7264_v7  ;;  %v623_v38 = vsub.f32 %v7252_v62, %v8495_v49  ;;  %v7285_v56 = vsub.f32 %v7162_v57, %v7193_v29  ;;  %v618_v34 = vand.u32 4294901760, %v617_v39 }
  0x80   : > { %8555 = vst [vmem:[#allocation32_spill] sm:$0xff] %v7276_v55  ;;  %v612_v27 = vand.u32 4294901760, %v611_v21  ;;  %607 = vmatprep.subr.mxu1 %v606_v35  ;;  %v629_v52 = vsub.f32 %v7261_v33, %v8501_v30  ;;  %v8500_v9 = vand.u32 4294901760, %v7276_v55  ;;  %v7293_v47 = vsub.f32 %v7185_v40, %v7210_v31 }
  0x81   : > { %v7295_v21 = vand.u32 4294901760, %v439_v45  ;;  %v624_v49 = vand.u32 4294901760, %v623_v38  ;;  %v8499_v7 = vand.u32 4294901760, %v7285_v56 }
  0x82   : > { %8556 = vst [vmem:[#allocation33_spill] sm:$0xff] %v7293_v47  ;;  %613 = vmatpush1.msra.mxu1 %v612_v27  ;;  %v630_v57 = vand.u32 4294901760, %v629_v52  ;;  %v635_v39 = vsub.f32 %v7276_v55, %v8500_v9  ;;  %v8498_v35 = vand.u32 4294901760, %v7293_v47  ;;  %v273_v52 = vld [vmem:[%s6870_s15 + $0x8] sm:$0xff]  ;;  %v8565_v9 = vld [vmem:[#allocation18_spill] sm:$0xff]  ;;  %s6625_s15 = scalar_lea.vmem %s6624_s7, 512 }
  0x83   : > { %8557 = vst [vmem:[#allocation34_spill] sm:$0xff] %v7295_v21  ;;  %619 = vmatprep.subr.mxu1 %v618_v34  ;;  %441 = vmatmul.mubr.f32.vlgmr.msra.gmra.mxu0 %v7295_v21  ;;  %v641_v40 = vsub.f32 %v7285_v56, %v8499_v7  ;;  %v8558_v34 = vmov 0.0   ;;  %v8564_v7 = vld [vmem:[#allocation17_spill] sm:$0xff]  ;;  %v8567_v21 = vld [vmem:[#allocation19_spill] sm:$0xff]  ;;  %p6627_p12 = scmp.lt.s32.totalorder %s6625_s15, %s6619_s13 }
  0x84   : > { %625 = vmatpush1.msra.mxu1 %v624_v49  ;;  %702 = vmatpush1.msra.mxu0 %v6915_v24  ;;  %v636_v27 = vand.u32 4294901760, %v635_v39  ;;  %v647_v45 = vsub.f32 %v7293_v47, %v8498_v35  ;;  %v8563_v35 = vld [vmem:[#allocation16_spill] sm:$0xff] }
  0x85   : > { %631 = vmatprep.subr.mxu1 %v630_v57  ;;  %705 = vmatprep.subr.mxu0 %v6921_v26  ;;  %v642_v38 = vand.u32 4294901760, %v641_v40  ;;  %v7322_v57 = vand.u32 4294901760, %v273_v52  ;;  %p6628_p3 = por %p6627_p12, %p6626_p6 }
  0x86   : > { %446 = vmatprep.mubr.f32.mxu0 %v8558_v34  ;;  %708 = vmatpush1.msra.mxu0 %v6935_v32  ;;  %v648_v49 = vand.u32 4294901760, %v647_v45  ;;  %v8560_v45 = vld [vmem:[#allocation13_spill] sm:$0xff] }
  0x87   : > { %637 = vmatpush1.msra.mxu1 %v636_v27  ;;  %711 = vmatprep.subr.mxu0 %v6944_v36  ;;  %v7333_v39 = vsub.f32 %v273_v52, %v7322_v57  ;;  %v8559_v27 = vld [vmem:[#allocation12_spill] sm:$0xff]  ;;  %v8562_v52 = vld [vmem:[#allocation15_spill] sm:$0xff]  ;;  %p6629_p9 = pnand %p6628_p3, %p6622_p2 }
  0x88   : > { %643 = vmatprep.subr.mxu1 %v642_v38  ;;  %714 = vmatpush1.msra.mxu0 %v6957_v41  ;;  %v8561_v38 = vld [vmem:[#allocation14_spill] sm:$0xff] }
  0x89   : > { %649 = vmatpush1.msra.mxu1 %v648_v49  ;;  %717 = vmatprep.subr.mxu0 %v6971_v46  ;;  %v7344_v40 = vand.u32 4294901760, %v7333_v39 }
  0x8a   : > { %684 = vmatmul.mubr.f32.vlgmr.msra.gmra.mxu1 %v7227_v37  ;;  %720 = vmatpush1.msra.mxu0 %v6997_v60  ;;  %v8568_v37 = vld [vmem:[#allocation20_spill] sm:$0xff] }
  0x8b   : > { %843 = vmatprep.subr.mxu1 %v6882_v4  ;;  %723 = vmatprep.subr.mxu0 %v7009_v2  ;;  %v450_v49 = vsub.f32 %v7333_v39, %v7344_v40 }
  0x8c   : > { %845 = vmatpush1.msra.mxu1 %v6884_v5  ;;  %726 = vmatpush1.msra.mxu0 %v7020_v13 }
  0x8d   : > { %847 = vmatprep.subr.mxu1 %v6886_v6  ;;  %729 = vmatprep.subr.mxu0 %v7031_v44  ;;  %v7364_v30 = vand.u32 4294901760, %v450_v49  ;;  %v8570_v49 = vld [vmem:[#allocation22_spill] sm:$0xff] }
  0x8e   : > { %849 = vmatpush1.msra.mxu1 %v6888_v10  ;;  %732 = vmatpush1.msra.mxu0 %v7043_v53 }
  0x8f   : > { %851 = vmatprep.subr.mxu1 %v6890_v11  ;;  %735 = vmatprep.subr.mxu0 %v7057_v59  ;;  %8566 = vst [vmem:[#allocation12_spill] sm:$0xff] %v7364_v30 }
  0x90   : > { %853 = vmatpush1.msra.mxu1 %v6892_v12  ;;  %738 = vmatpush1.msra.mxu0 %v7069_v43 }
  0x91   : > { %855 = vmatprep.subr.mxu1 %v6895_v16  ;;  %741 = vmatprep.subr.mxu0 %v7090_v58 }
  0x92   : > { %857 = vmatpush1.msra.mxu1 %v6897_v17  ;;  %744 = vmatpush1.msra.mxu0 %v7103_v8 }
  0x93   : > { %859 = vmatprep.subr.mxu1 %v6899_v18  ;;  %747 = vmatprep.subr.mxu0 %v7121_v50 }
  0x94   : > { %861 = vmatpush1.msra.mxu1 %v6912_v23  ;;  %750 = vmatpush1.msra.mxu0 %v7134_v63 }
  0x95   : > { %863 = vmatprep.subr.mxu1 %v6918_v25  ;;  %753 = vmatprep.subr.mxu0 %v7146_v61 }
  0x96   : > { %865 = vmatpush1.msra.mxu1 %v8559_v27  ;;  %756 = vmatpush1.msra.mxu0 %v7157_v28 }
  0x97   : > { %867 = vmatprep.subr.mxu1 %v8560_v45  ;;  %759 = vmatprep.subr.mxu0 %v7171_v3 }
  0x98   : > { %869 = vmatpush1.msra.mxu1 %v8561_v38  ;;  %762 = vmatpush1.msra.mxu0 %v7183_v51 }
  0x99   : > { %871 = vmatprep.subr.mxu1 %v8562_v52  ;;  %765 = vmatprep.subr.mxu0 %v7202_v0 }
  0x9a   : > { %873 = vmatpush1.msra.mxu1 %v8563_v35  ;;  %768 = vmatpush1.msra.mxu0 %v7214_v15  ;;  %v8569_v35 = vld [vmem:[#allocation21_spill] sm:$0xff] }
  0x9b   : > { %875 = vmatprep.subr.mxu1 %v8564_v7  ;;  %771 = vmatprep.subr.mxu0 %v7223_v54 }
  0x9c   : > { %877 = vmatpush1.msra.mxu1 %v8565_v9  ;;  %774 = vmatpush1.msra.mxu0 %v7231_v22  ;;  %v8571_v9 = vld [vmem:[#allocation23_spill] sm:$0xff] }
  0x9d   : > { %879 = vmatprep.subr.mxu1 %v8567_v21  ;;  %777 = vmatprep.subr.mxu0 %v7240_v48 }
  0x9e   : > { %881 = vmatpush1.msra.mxu1 %v8568_v37  ;;  %780 = vmatpush1.msra.mxu0 %v7252_v62 }
  0x9f   : > { %883 = vmatprep.subr.mxu1 %v8569_v35  ;;  %452 = vmatmul.mubr.f32.gmra.mxu0 %v7364_v30  ;;  %v8572_v30 = vand.u32 4294901760, %v6902_v19  ;;  %v8579_v19 = vld [vmem:[#allocation28_spill] sm:$0xff] }
  0xa0   : > { %783 = vmatprep.subr.mxu0 %v7261_v33  ;;  %885 = vmatpush1.msra.mxu1 %v8570_v49  ;;  %v8574_v49 = vand.u32 4294901760, %v6915_v24  ;;  %v8580_v24 = vand.u32 4294901760, %v6944_v36  ;;  %v8584_v36 = vld [vmem:[#allocation31_spill] sm:$0xff] }
  0xa1   : > { %786 = vmatpush1.msra.mxu0 %v7276_v55  ;;  %887 = vmatprep.subr.mxu1 %v8571_v9  ;;  %v8573_v55 = vld [vmem:[#allocation25_spill] sm:$0xff]  ;;  %v8575_v9 = vld [vmem:[#allocation26_spill] sm:$0xff] }
  0xa2   : > { %789 = vmatprep.subr.mxu0 %v7285_v56  ;;  %825 = vmatprep.mubr.f32.mxu0 %v8558_v34 }
  0xa3   : > { %792 = vmatpush1.msra.mxu0 %v7293_v47  ;;  %889 = vmatpush1.msra.mxu1 %v7099_v1  ;;  %v8576_v47 = vand.u32 4294901760, %v6921_v26  ;;  %v8581_v26 = vand.u32 4294901760, %v6957_v41  ;;  %v8586_v41 = vand.u32 4294901760, %v7020_v13  ;;  %v8603_v13 = vand.u32 4294901760, %v7231_v22 }
  0xa4   : > { %828 = vmatmul.mubr.f32.vlgmr.msra.gmra.mxu0 %v7247_v14  ;;  %891 = vmatprep.subr.mxu1 %v7113_v20  ;;  %v8577_v14 = vld [vmem:[#allocation27_spill] sm:$0xff]  ;;  %v8578_v20 = vand.u32 4294901760, %v6935_v32  ;;  %v8583_v32 = vand.u32 4294901760, %v6997_v60  ;;  %v8588_v60 = vand.u32 4294901760, %v7043_v53  ;;  %v8606_v53 = vand.u32 4294901760, %v7252_v62 }
  0xa5   : > { %960 = vmatprep.subr.mxu0 %v8572_v30  ;;  %893 = vmatpush1.msra.mxu1 %v8573_v55  ;;  %v8582_v30 = vand.u32 4294901760, %v6971_v46  ;;  %v8587_v46 = vand.u32 4294901760, %v7031_v44  ;;  %v8605_v44 = vand.u32 4294901760, %v7240_v48  ;;  %v324_v48 = vlaneseq }
  0xa6   : > { %964 = vmatpush1.msra.mxu0 %v8574_v49  ;;  %689 = vmatprep.mubr.f32.mxu1 %v8558_v34 }
  0xa7   : > { %895 = vmatprep.subr.mxu1 %v8575_v9  ;;  %968 = vmatprep.subr.mxu0 %v8576_v47 }
  0xa8   : > { %691 = vmatmul.mubr.f32.gmra.mxu1 %v7322_v57  ;;  %972 = vmatpush1.msra.mxu0 %v8578_v20  ;;  %v8585_v20 = vand.u32 4294901760, %v7009_v2  ;;  %v8589_v2 = vand.u32 4294901760, %v7057_v59 }
  0xa9   : > { %897 = vmatpush1.msra.mxu1 %v8577_v14  ;;  %833 = vmatprep.mubr.f32.mxu0 %v8558_v34 }
  0xaa   : > { %899 = vmatprep.subr.mxu1 %v8579_v19  ;;  %976 = vmatprep.subr.mxu0 %v8580_v24 }
  0xab   : > { %836 = vmatmul.mubr.f32.gmra.mxu0 %v7333_v39  ;;  %901 = vmatpush1.msra.mxu1 %v7179_v42 }
  0xac   : > { %980 = vmatpush1.msra.mxu0 %v8581_v26  ;;  %903 = vmatprep.subr.mxu1 %v7193_v29 }
  0xad   : > { %984 = vmatprep.subr.mxu0 %v8582_v30  ;;  %905 = vmatpush1.msra.mxu1 %v7210_v31 }
  0xae   : > { %938 = vmatprep.mubr.f32.mxu1 %v8558_v34  ;;  %988 = vmatpush1.msra.mxu0 %v8583_v32 }
  0xaf   : > { %942 = vmatmul.mubr.f32.vlgmr.msra.gmra.mxu1 %v8584_v36  ;;  %992 = vmatprep.subr.mxu0 %v8585_v20 }
  0xb0   : > { %1133 = vmatprep.subr.mxu1 %v6882_v4  ;;  %996 = vmatpush1.msra.mxu0 %v8586_v41  ;;  %v8590_v4 = vand.u32 4294901760, %v7069_v43  ;;  %v8604_v43 = vld [vmem:[#allocation18_spill] sm:$0xff] }
  0xb1   : > { %1135 = vmatpush1.msra.mxu1 %v6884_v5  ;;  %1000 = vmatprep.subr.mxu0 %v8587_v46  ;;  %v8591_v5 = vand.u32 4294901760, %v7090_v58  ;;  %v8608_v58 = vld [vmem:[#allocation32_spill] sm:$0xff] }
  0xb2   : > { %1137 = vmatprep.subr.mxu1 %v6886_v6  ;;  %947 = vmatprep.mubr.f32.mxu1 %v8558_v34  ;;  %v8592_v6 = vand.u32 4294901760, %v7103_v8  ;;  %v8609_v59 = vand.u32 4294901760, %v8608_v58  ;;  %v8610_v8 = vld [vmem:[#allocation22_spill] sm:$0xff] }
  0xb3   : > { %1004 = vmatpush1.msra.mxu0 %v8588_v60  ;;  %1139 = vmatpush1.msra.mxu1 %v6888_v10  ;;  %v8593_v10 = vand.u32 4294901760, %v7121_v50  ;;  %v8612_v50 = vld [vmem:[#allocation23_spill] sm:$0xff] }
  0xb4   : > { %1008 = vmatprep.subr.mxu0 %v8589_v2  ;;  %951 = vmatmul.mubr.f32.gmra.mxu1 %v7344_v40 }
  0xb5   : > { %1141 = vmatprep.subr.mxu1 %v6890_v11  ;;  %1012 = vmatpush1.msra.mxu0 %v8590_v4  ;;  %v8594_v11 = vand.u32 4294901760, %v7134_v63  ;;  %v8613_v63 = vld [vmem:[#allocation33_spill] sm:$0xff] }
  0xb6   : > { %1143 = vmatpush1.msra.mxu1 %v6892_v12  ;;  %1016 = vmatprep.subr.mxu0 %v8591_v5  ;;  %v8595_v12 = vand.u32 4294901760, %v7146_v61  ;;  %v8601_v61 = vld [vmem:[#allocation16_spill] sm:$0xff]  ;;  %v8614_v47 = vand.u32 4294901760, %v8613_v63 }
  0xb7   : > { %1145 = vmatprep.subr.mxu1 %v6895_v16  ;;  %1020 = vmatpush1.msra.mxu0 %v8592_v6  ;;  %v8596_v16 = vand.u32 4294901760, %v7157_v28  ;;  %v8611_v28 = vand.u32 4294901760, %v7285_v56  ;;  %v7510_v56 = vld [vmem:[%s8432_s2] sm:$0x7] }
  0xb8   : > { %1147 = vmatpush1.msra.mxu1 %v6897_v17  ;;  %1024 = vmatprep.subr.mxu0 %v8593_v10  ;;  %v8597_v17 = vand.u32 4294901760, %v7171_v3  ;;  %v8602_v3 = vand.u32 4294901760, %v7223_v54  ;;  %v8607_v54 = vand.u32 4294901760, %v7261_v33  ;;  %8619 = vst [vmem:[#allocation14_spill] sm:$0xff] %v7510_v56 }
  0xb9   : > { %1149 = vmatprep.subr.mxu1 %v6899_v18  ;;  %1028 = vmatpush1.msra.mxu0 %v8594_v11  ;;  %v8598_v18 = vand.u32 4294901760, %v7183_v51  ;;  %v8615_v51 = vld [vmem:[#allocation29_spill] sm:$0xff] }
  0xba   : > { %1151 = vmatpush1.msra.mxu1 %v6912_v23  ;;  %1032 = vmatprep.subr.mxu0 %v8595_v12  ;;  %v8599_v23 = vand.u32 4294901760, %v7202_v0  ;;  %v8616_v0 = vld [vmem:[#allocation24_spill] sm:$0xff] }
  0xbb   : > { %1153 = vmatprep.subr.mxu1 %v6918_v25  ;;  %1036 = vmatpush1.msra.mxu0 %v8596_v16  ;;  %v8600_v25 = vand.u32 4294901760, %v7214_v15  ;;  %v8617_v15 = vld [vmem:[#allocation34_spill] sm:$0xff] }
  0xbc   : > { %1155 = vmatpush1.msra.mxu1 %v8559_v27  ;;  %1040 = vmatprep.subr.mxu0 %v8597_v17 }
  0xbd   : > { %1157 = vmatprep.subr.mxu1 %v8560_v45  ;;  %1044 = vmatpush1.msra.mxu0 %v8598_v18 }
  0xbe   : > { %1159 = vmatpush1.msra.mxu1 %v8561_v38  ;;  %1048 = vmatprep.subr.mxu0 %v8599_v23 }
  0xbf   : > { %1161 = vmatprep.subr.mxu1 %v8562_v52  ;;  %1052 = vmatpush1.msra.mxu0 %v8600_v25 }
  0xc0   : > { %1163 = vmatpush1.msra.mxu1 %v8601_v61  ;;  %1056 = vmatprep.subr.mxu0 %v8602_v3 }
  0xc1   : > { %1165 = vmatprep.subr.mxu1 %v8564_v7  ;;  %1060 = vmatpush1.msra.mxu0 %v8603_v13 }
  0xc2   : > { %1167 = vmatpush1.msra.mxu1 %v8604_v43  ;;  %1064 = vmatprep.subr.mxu0 %v8605_v44 }
  0xc3   : > { %1169 = vmatprep.subr.mxu1 %v8567_v21  ;;  %1068 = vmatpush1.msra.mxu0 %v8606_v53 }
  0xc4   : > { %1171 = vmatpush1.msra.mxu1 %v8568_v37  ;;  %1072 = vmatprep.subr.mxu0 %v8607_v54 }
  0xc5   : > { %1173 = vmatprep.subr.mxu1 %v8569_v35  ;;  %1076 = vmatpush1.msra.mxu0 %v8609_v59 }
  0xc6   : > { %1175 = vmatpush1.msra.mxu1 %v8610_v8  ;;  %1080 = vmatprep.subr.mxu0 %v8611_v28 }
  0xc7   : > { %1177 = vmatprep.subr.mxu1 %v8612_v50  ;;  %1084 = vmatpush1.msra.mxu0 %v8614_v47 }
  0xc8   : > { %1117 = vmatprep.mubr.f32.mxu0 %v8558_v34  ;;  %1179 = vmatpush1.msra.mxu1 %v7099_v1 }
  0xc9   : > { %1119 = vmatmul.mubr.f32.vlgmr.msra.gmra.mxu0 %v8615_v51  ;;  %1181 = vmatprep.subr.mxu1 %v8616_v0 }
  0xca   : > { %1124 = vmatprep.mubr.f32.mxu0 %v8558_v34  ;;  %1183 = vmatpush1.msra.mxu1 %v8573_v55 }
  0xcb   : > { %1228 = vmatprep.mubr.f32.mxu1 %v8558_v34  ;;  %1185 = vmatprep.subr.mxu1 %v8575_v9 }
  0xcc   : > { %1187 = vmatpush1.msra.mxu1 %v8577_v14 }
  0xcd   : > { %1126 = vmatmul.mubr.f32.gmra.mxu0 %v7322_v57  ;;  %1189 = vmatprep.subr.mxu1 %v8579_v19 }
  0xce   : > { %5858 = vmatprep.mubr.f32.mxu0 %v8617_v15  ;;  %1191 = vmatpush1.msra.mxu1 %v7179_v42  ;;  %v7504_v42 = vshrl.u32 %v324_v48, 7 }
  0xcf   : > { %1193 = vmatprep.subr.mxu1 %v7193_v29 }
  0xd0   : > { %1195 = vmatpush1.msra.mxu1 %v7210_v31  ;;  %8618 = vst [vmem:[#allocation13_spill] sm:$0xff] %v7504_v42  ;;  %v326_v31 = vsub.s32 0, %v7504_v42  ;;  %v330_v27 = vsub.s32 1, %v7504_v42 }
  0xd1   : > { %1230 = vmatmul.mubr.f32.vlgmr.msra.gmra.mxu1 %v8615_v51 }
  0xd2   : > { %1235 = vmatprep.mubr.f32.mxu1 %v8558_v34  ;;  %v327_v21 = vrot.slane %v7510_v56, %v326_v31  ;;  %v331_v49 = vrot.slane %v7510_v56, %v330_v27  ;;  %v312_v31 = vld [vmem:[#allocation5 + $0x130] sm:$0xff] }
  0xd5   : > { %1237 = vmatmul.mubr.f32.gmra.mxu1 %v7322_v57 }
  0xd6   : > { %5893 = vmatprep.mubr.f32.mxu1 %v8615_v51 }
 0x143   : > { %v442_v1 = vpop.f32.mrf.mxu0 }
 0x144   : > { %v443_v45 = vadd.f32 %v442_v1, %v327_v21  ;;  %v321_v1 = vld [vmem:[#allocation5 + $0x178] sm:$0xff] }
 0x145   : > { %v444_v62 = vpop.f32.mrf.mxu0 }
 0x146   : > { %v445_v60 = vadd.f32 %v444_v62, %v331_v49  ;;  %v7531_v62 = vand.u32 4294901760, %v321_v1 }
 0x148   : > { %5826 = vmatprep.subr.mxu0 %v7531_v62  ;;  %v7537_v48 = vsub.f32 %v321_v1, %v7531_v62 }
 0x149   : > { %5827 = vmatpush3.msra.mxu0 %v7531_v62 }
 0x14a   : > { %v685_v22 = vpop.f32.mrf.mxu1 }
 0x14b   : > { %v686_v26 = vadd.f32 %v685_v22, %v443_v45 }
 0x14c   : > { %v687_v7 = vpop.f32.mrf.mxu1 }
 0x14d   : > { %v688_v16 = vadd.f32 %v687_v7, %v445_v60  ;;  %v7542_v7 = vand.u32 4294901760, %v7537_v48  ;;  %v297_v60 = vld [vmem:[#allocation5 + $0xb8] sm:$0xff] }
 0x15f   : > { %v453_v37 = vpop.f32.mrf.mxu0 }
 0x160   : > { %v454_v19 = vadd.f32 %v453_v37, %v327_v21  ;;  %v318_v37 = vld [vmem:[#allocation5 + $0x160] sm:$0xff]  ;;  %v7556_v21 = vand.u32 4294901760, %v312_v31 }
 0x161   : > { %v455_v14 = vpop.f32.mrf.mxu0  ;;  %v7534_v22 = vand.u32 4294901760, %v318_v37 }
 0x162   : > { %v456_v30 = vadd.f32 %v455_v14, %v331_v49  ;;  %v315_v14 = vld [vmem:[#allocation5 + $0x148] sm:$0xff]  ;;  %v7572_v49 = vsub.f32 %v312_v31, %v7556_v21 }
 0x163   : > { %5828 = vmatprep.subr.mxu0 %v7534_v22 }
 0x164   : > { %v829_v29 = vpop.f32.mrf.mxu0  ;;  %5829 = vmatpush3.msra.mxu0 %v7534_v22 }
 0x165   : > { %v830_v41 = vadd.f32 %v829_v29, %v686_v26  ;;  %v7544_v29 = vand.u32 4294901760, %v315_v14 }
 0x166   : > { %v831_v55 = vpop.f32.mrf.mxu0 }
 0x167   : > { %v832_v3 = vadd.f32 %v831_v55, %v688_v16  ;;  %v1348_v55 = vsub.f32 %v7537_v48, %v7542_v7  ;;  %5830 = vmatprep.subr.mxu0 %v7544_v29 }
 0x168   : > { %v692_v33 = vpop.f32.mrf.mxu1  ;;  %5831 = vmatpush3.msra.mxu0 %v7544_v29 }
 0x169   : > { %v693_v46 = vadd.f32 %v692_v33, %v454_v19  ;;  %v7547_v33 = vsub.f32 %v318_v37, %v7534_v22  ;;  %v1349_v27 = vand.u32 4294901760, %v1348_v55  ;;  %5832 = vmatprep.subr.mxu0 %v7556_v21  ;;  %v306_v19 = vld [vmem:[#allocation5 + $0x100] sm:$0xff] }
 0x16a   : > { %v694_v9 = vpop.f32.mrf.mxu1  ;;  %5833 = vmatpush3.msra.mxu0 %v7556_v21  ;;  %v282_v55 = vld [vmem:[#allocation5 + $0x40] sm:$0xff] }
 0x16b   : > { %v837_v35 = vpop.f32.mrf.mxu0  ;;  %v695_v2 = vadd.f32 %v694_v9, %v456_v30  ;;  %v7554_v9 = vand.u32 4294901760, %v7547_v33  ;;  %5861 = vmatprep.subr.mxu1 %v1349_v27  ;;  %v7577_v30 = vand.u32 4294901760, %v306_v19 }
 0x16c   : > { %v838_v10 = vadd.f32 %v837_v35, %v693_v46  ;;  %v7559_v35 = vsub.f32 %v315_v14, %v7544_v29  ;;  %5862 = vmatpush3.msra.mxu1 %v1349_v27  ;;  %v300_v46 = vld [vmem:[#allocation5 + $0xd0] sm:$0xff] }
 0x16d   : > { %v839_v38 = vpop.f32.mrf.mxu0  ;;  %v1355_v45 = vsub.f32 %v7547_v33, %v7554_v9  ;;  %v7598_v16 = vand.u32 4294901760, %v300_v46 }
 0x16e   : > { %v840_v17 = vadd.f32 %v839_v38, %v695_v2  ;;  %v7566_v38 = vand.u32 4294901760, %v7559_v35 }
 0x16f   : > { %v943_v34 = vpop.f32.mrf.mxu1 }
 0x170   : > { %v944_v4 = vadd.f32 %v943_v34, %v830_v41  ;;  %v309_v34 = vld [vmem:[#allocation5 + $0x118] sm:$0xff]  ;;  %v1362_v26 = vsub.f32 %v7559_v35, %v7566_v38  ;;  %v303_v41 = vld [vmem:[#allocation5 + $0xe8] sm:$0xff] }
 0x171   : > { %v945_v52 = vpop.f32.mrf.mxu1 }
 0x172   : > { %v946_v54 = vadd.f32 %v945_v52, %v832_v3  ;;  %v7568_v52 = vand.u32 4294901760, %v309_v34  ;;  %v1363_v2 = vand.u32 4294901760, %v1362_v26 }
 0x174   : > { %v952_v32 = vpop.f32.mrf.mxu1  ;;  %5834 = vmatprep.subr.mxu0 %v7568_v52 }
 0x175   : > { %v953_v18 = vadd.f32 %v952_v32, %v838_v10  ;;  %v7580_v32 = vsub.f32 %v309_v34, %v7568_v52  ;;  %5835 = vmatpush3.msra.mxu0 %v7568_v52  ;;  %v294_v10 = vld [vmem:[#allocation5 + $0xa0] sm:$0xff] }
 0x176   : > { %v954_v5 = vpop.f32.mrf.mxu1  ;;  %5836 = vmatprep.subr.mxu0 %v7577_v30 }
 0x177   : > { %v955_v13 = vadd.f32 %v954_v5, %v840_v17  ;;  %v7590_v5 = vand.u32 4294901760, %v303_v41  ;;  %5837 = vmatpush3.msra.mxu0 %v7577_v30  ;;  %v7600_v17 = vand.u32 4294901760, %v297_v60 }
 0x179   : > { %5838 = vmatprep.subr.mxu0 %v7590_v5 }
 0x17a   : > { %5839 = vmatpush3.msra.mxu0 %v7590_v5 }
 0x17b   : > { %5840 = vmatprep.subr.mxu0 %v7598_v16 }
 0x17c   : > { %5841 = vmatpush3.msra.mxu0 %v7598_v16 }
 0x17d   : > { %5842 = vmatprep.subr.mxu0 %v7600_v17 }
 0x17e   : > { %5843 = vmatpush3.msra.mxu0 %v7600_v17 }
 0x189   : > { %v1120_v24 = vpop.f32.mrf.mxu0 }
 0x18a   : > { %v1121_v11 = vadd.f32 %v1120_v24, %v944_v4  ;;  %v1356_v24 = vand.u32 4294901760, %v1355_v45  ;;  %v7588_v4 = vand.u32 4294901760, %v7580_v32 }
 0x18b   : > { %v1122_v20 = vpop.f32.mrf.mxu0 }
 0x18c   : > { %v1123_v28 = vadd.f32 %v1122_v20, %v946_v54  ;;  %v7583_v20 = vand.u32 4294901760, %v7572_v49  ;;  %5863 = vmatprep.subr.mxu1 %v1356_v24  ;;  %v7620_v54 = vsub.f32 %v297_v60, %v7600_v17 }
 0x18d   : > { %v1127_v6 = vpop.f32.mrf.mxu0  ;;  %5864 = vmatpush3.msra.mxu1 %v1356_v24 }
 0x18e   : > { %v1128_v43 = vadd.f32 %v1127_v6, %v953_v18  ;;  %v7593_v6 = vsub.f32 %v306_v19, %v7577_v30  ;;  %v7602_v18 = vand.u32 4294901760, %v294_v10  ;;  %5865 = vmatprep.subr.mxu1 %v1363_v2  ;;  %v7638_v37 = vand.u32 4294901760, %v7620_v54 }
 0x18f   : > { %v1129_v25 = vpop.f32.mrf.mxu0  ;;  %5866 = vmatpush3.msra.mxu1 %v1363_v2  ;;  %v7663_v2 = vand.u32 4294901760, %v282_v55 }
 0x190   : > { %v1130_v58 = vadd.f32 %v1129_v25, %v955_v13  ;;  %v288_v25 = vld [vmem:[#allocation5 + $0x70] sm:$0xff]  ;;  %v7608_v3 = vand.u32 4294901760, %v7593_v6  ;;  %v7611_v13 = vsub.f32 %v303_v41, %v7590_v5  ;;  %v1404_v26 = vsub.f32 %v7620_v54, %v7638_v37  ;;  %5844 = vmatprep.subr.mxu0 %v7602_v18 }
 0x191   : > { %v1231_v12 = vpop.f32.mrf.mxu1  ;;  %5845 = vmatpush3.msra.mxu0 %v7602_v18 }
 0x192   : > { %v7515_v23 = vadd.f32 %v1231_v12, %v1121_v11  ;;  %v291_v11 = vld [vmem:[#allocation5 + $0x88] sm:$0xff]  ;;  %v1369_v12 = vsub.f32 %v7572_v49, %v7583_v20 }
 0x193   : > { %v1233_v61 = vpop.f32.mrf.mxu1 }
 0x194   : > { %v1935_v44 = vsel %vm1934_vm0, %v7515_v23, 0.0  ;;  %v7525_v47 = vadd.f32 %v1233_v61, %v1123_v28  ;;  %v1376_v61 = vsub.f32 %v7580_v32, %v7588_v4 }
 0x195   : > { %v1238_v53 = vpop.f32.mrf.mxu1  ;;  %1936 = vadd.xlane.f32.xlu1 %v1935_v44  ;;  %v1370_v44 = vand.u32 4294901760, %v1369_v12 }
 0x196   : > { %v7519_v59 = vadd.f32 %v1238_v53, %v1128_v43  ;;  %8621 = vst [vmem:[#allocation17_spill] sm:$0xff] %v7525_v47  ;;  %v1962_v15 = vsel %vm1934_vm0, %v7525_v47, 0.0  ;;  %v7613_v43 = vand.u32 4294901760, %v291_v11  ;;  %v7617_v53 = vsub.f32 %v300_v46, %v7598_v16  ;;  %v279_v46 = vld [vmem:[#allocation5 + $0x28] sm:$0xff] }
 0x197   : > { %v1240_v8 = vpop.f32.mrf.mxu1  ;;  %v1377_v28 = vand.u32 4294901760, %v1376_v61  ;;  %5867 = vmatprep.subr.mxu1 %v1370_v44 }
 0x198   : > { %8620 = vst [vmem:[#allocation15_spill] sm:$0xff] %v7519_v59  ;;  %v7521_v50 = vadd.f32 %v1240_v8, %v1130_v58  ;;  %v1938_v63 = vsel %vm1934_vm0, %v7519_v59, 0.0  ;;  %v7623_v58 = vsub.f32 %v294_v10, %v7602_v18  ;;  %v285_v8 = vld [vmem:[#allocation5 + $0x58] sm:$0xff]  ;;  %v7635_v1 = vand.u32 4294901760, %v7617_v53  ;;  %5868 = vmatpush3.msra.mxu1 %v1370_v44  ;;  %5846 = vmatprep.subr.mxu0 %v7613_v43 }
 0x199   : > { %1939 = vadd.xlane.f32.xlu1 %v1938_v63  ;;  %v1383_v63 = vsub.f32 %v7593_v6, %v7608_v3  ;;  %v7644_v31 = vsub.f32 %v291_v11, %v7613_v43  ;;  %v7649_v45 = vand.u32 4294901760, %v285_v8  ;;  %5869 = vmatprep.subr.mxu1 %v1377_v28  ;;  %v276_v11 = vld [vmem:[#allocation5 + $0x10] sm:$0xff]  ;;  %v7675_v44 = vand.u32 4294901760, %v279_v46 }
 0x19a   : > { %v1965_v0 = vsel %vm1934_vm0, %v7521_v50, 0.0  ;;  %v7641_v14 = vand.u32 4294901760, %v7623_v58  ;;  %v1397_v24 = vsub.f32 %v7617_v53, %v7635_v1  ;;  %5870 = vmatpush3.msra.mxu1 %v1377_v28  ;;  %v7678_v28 = vsub.f32 %v282_v55, %v7663_v2  ;;  %5847 = vmatpush3.msra.mxu0 %v7613_v43 }
 0x19b   : > { %1966 = vadd.xlane.f32.xlu0 %v1965_v0  ;;  %v7629_v0 = vand.u32 4294901760, %v7611_v13  ;;  %v1384_v34 = vand.u32 4294901760, %v1383_v63  ;;  %v7660_v41 = vand.u32 4294901760, %v7644_v31  ;;  %v7666_v10 = vsub.f32 %v285_v8, %v7649_v45 }
 0x19c   : > { %v1398_v12 = vand.u32 4294901760, %v1397_v24  ;;  %v1405_v8 = vand.u32 4294901760, %v1404_v26  ;;  %v7686_v24 = vand.u32 4294901760, %v276_v11  ;;  %v7696_v56 = vand.u32 4294901760, %v7678_v28 }
 0x19d   : > { %v1390_v27 = vsub.f32 %v7611_v13, %v7629_v0  ;;  %5871 = vmatprep.subr.mxu1 %v1384_v34  ;;  %v1418_v63 = vsub.f32 %v7644_v31, %v7660_v41 }
 0x19e   : > { %5872 = vmatpush3.msra.mxu1 %v1384_v34  ;;  %v7690_v34 = vsub.f32 %v279_v46, %v7675_v44  ;;  %v7699_v42 = vsub.f32 %v276_v11, %v7686_v24  ;;  %v1439_v11 = vsub.f32 %v7678_v28, %v7696_v56 }
 0x19f   : > { %1963 = vadd.xlane.f32.xlu0 %v1962_v15  ;;  %v7631_v15 = vand.u32 4294901760, %v288_v25  ;;  %v1391_v60 = vand.u32 4294901760, %v1390_v27  ;;  %v7684_v27 = vand.u32 4294901760, %v7666_v10 }
 0x1a1   : > { %v7652_v19 = vsub.f32 %v288_v25, %v7631_v15  ;;  %v1411_v25 = vsub.f32 %v7623_v58, %v7641_v14  ;;  %5873 = vmatprep.subr.mxu1 %v1391_v60  ;;  %5848 = vmatprep.subr.mxu0 %v7631_v15  ;;  %v1432_v46 = vsub.f32 %v7666_v10, %v7684_v27 }
 0x1a2   : > { %5874 = vmatpush3.msra.mxu1 %v1391_v60  ;;  %5849 = vmatpush3.msra.mxu0 %v7631_v15  ;;  %v1419_v60 = vand.u32 4294901760, %v1418_v63 }
 0x1a3   : > { %v7672_v61 = vand.u32 4294901760, %v7652_v19  ;;  %5875 = vmatprep.subr.mxu1 %v1398_v12  ;;  %v1412_v55 = vand.u32 4294901760, %v1411_v25  ;;  %5850 = vmatprep.subr.mxu0 %v7649_v45  ;;  %v7706_v25 = vand.u32 4294901760, %v7690_v34  ;;  %v1433_v63 = vand.u32 4294901760, %v1432_v46  ;;  %v8622_v46 = vld [vmem:[#allocation12_spill] sm:$0xff] }
 0x1a4   : > { %5876 = vmatpush3.msra.mxu1 %v1398_v12  ;;  %5851 = vmatpush3.msra.mxu0 %v7649_v45  ;;  %v7713_v12 = vand.u32 4294901760, %v7699_v42 }
 0x1a5   : > { %v1425_v26 = vsub.f32 %v7652_v19, %v7672_v61  ;;  %5877 = vmatprep.subr.mxu1 %v1405_v8  ;;  %5852 = vmatprep.subr.mxu0 %v7663_v2 }
 0x1a6   : > { %5878 = vmatpush3.msra.mxu1 %v1405_v8  ;;  %5853 = vmatpush3.msra.mxu0 %v7663_v2  ;;  %v1446_v8 = vsub.f32 %v7690_v34, %v7706_v25  ;;  %v1453_v59 = vsub.f32 %v7699_v42, %v7713_v12 }
 0x1a7   : > { %5879 = vmatprep.subr.mxu1 %v1412_v55  ;;  %v1426_v47 = vand.u32 4294901760, %v1425_v26  ;;  %5854 = vmatprep.subr.mxu0 %v7675_v44  ;;  %v1440_v26 = vand.u32 4294901760, %v1439_v11 }
 0x1a8   : > { %5880 = vmatpush3.msra.mxu1 %v1412_v55  ;;  %5855 = vmatpush3.msra.mxu0 %v7675_v44  ;;  %v1447_v55 = vand.u32 4294901760, %v1446_v8 }
 0x1a9   : > { %5881 = vmatprep.subr.mxu1 %v1419_v60  ;;  %5856 = vmatprep.subr.mxu0 %v7686_v24 }
 0x1aa   : > { %5882 = vmatpush3.msra.mxu1 %v1419_v60  ;;  %5857 = vmatpush3.msra.mxu0 %v7686_v24  ;;  %v1454_v60 = vand.u32 4294901760, %v1453_v59  ;;  %v8623_v59 = vld [vmem:[#allocation30_spill] sm:$0xff] }
 0x1ab   : > { %5883 = vmatprep.subr.mxu1 %v1426_v47  ;;  %5896 = vmatprep.subr.mxu0 %v7537_v48 }
 0x1ac   : > { %5884 = vmatpush3.msra.mxu1 %v1426_v47  ;;  %5859 = vmatmul.mubr.f32.vlgmr.msra.gmra.mxu0 %v8622_v46 }
 0x1ad   : > { %5885 = vmatprep.subr.mxu1 %v1433_v63  ;;  %5897 = vmatpush3.msra.mxu0 %v7537_v48 }
 0x1ae   : > { %5886 = vmatpush3.msra.mxu1 %v1433_v63  ;;  %5898 = vmatprep.subr.mxu0 %v7547_v33 }
 0x1af   : > { %5887 = vmatprep.subr.mxu1 %v1440_v26  ;;  %5899 = vmatpush3.msra.mxu0 %v7547_v33  ;;  %v8624_v33 = vld [vmem:[#allocation15_spill] sm:$0xff] }
 0x1b0   : > { %5888 = vmatpush3.msra.mxu1 %v1440_v26  ;;  %5900 = vmatprep.subr.mxu0 %v7559_v35 }
 0x1b1   : > { %5889 = vmatprep.subr.mxu1 %v1447_v55  ;;  %5901 = vmatpush3.msra.mxu0 %v7559_v35 }
 0x1b2   : > { %5890 = vmatpush3.msra.mxu1 %v1447_v55  ;;  %5902 = vmatprep.subr.mxu0 %v7572_v49 }
 0x1b3   : > { %5891 = vmatprep.subr.mxu1 %v1454_v60  ;;  %5903 = vmatpush3.msra.mxu0 %v7572_v49 }
 0x1b4   : > { %5892 = vmatpush3.msra.mxu1 %v1454_v60  ;;  %5904 = vmatprep.subr.mxu0 %v7580_v32 }
 0x1b5   : > { %5931 = vmatprep.subr.mxu1 %v7531_v62  ;;  %5894 = vmatmul.mubr.f32.vlgmr.msra.gmra.mxu1 %v7322_v57 }
 0x1b6   : > { %5932 = vmatpush3.msra.mxu1 %v7531_v62  ;;  %5905 = vmatpush3.msra.mxu0 %v7580_v32 }
 0x1b7   : > { %5933 = vmatprep.subr.mxu1 %v7534_v22  ;;  %5906 = vmatprep.subr.mxu0 %v7593_v6 }
 0x1b8   : > { %5934 = vmatpush3.msra.mxu1 %v7534_v22  ;;  %5907 = vmatpush3.msra.mxu0 %v7593_v6 }
 0x1b9   : > { %5935 = vmatprep.subr.mxu1 %v7544_v29  ;;  %5908 = vmatprep.subr.mxu0 %v7611_v13 }
 0x1ba   : > { %5936 = vmatpush3.msra.mxu1 %v7544_v29  ;;  %5909 = vmatpush3.msra.mxu0 %v7611_v13 }
 0x1bb   : > { %5937 = vmatprep.subr.mxu1 %v7556_v21  ;;  %5910 = vmatprep.subr.mxu0 %v7617_v53 }
 0x1bc   : > { %5938 = vmatpush3.msra.mxu1 %v7556_v21  ;;  %5911 = vmatpush3.msra.mxu0 %v7617_v53 }
 0x1bd   : > { %5939 = vmatprep.subr.mxu1 %v7568_v52  ;;  %5912 = vmatprep.subr.mxu0 %v7620_v54 }
 0x1be   : > { %5940 = vmatpush3.msra.mxu1 %v7568_v52  ;;  %5913 = vmatpush3.msra.mxu0 %v7620_v54 }
 0x1bf   : > { %5941 = vmatprep.subr.mxu1 %v7577_v30  ;;  %5914 = vmatprep.subr.mxu0 %v7623_v58 }
 0x1c0   : > { %5942 = vmatpush3.msra.mxu1 %v7577_v30  ;;  %5915 = vmatpush3.msra.mxu0 %v7623_v58 }
 0x1c1   : > { %5943 = vmatprep.subr.mxu1 %v7590_v5  ;;  %5916 = vmatprep.subr.mxu0 %v7644_v31 }
 0x1c2   : > { %5944 = vmatpush3.msra.mxu1 %v7590_v5  ;;  %5917 = vmatpush3.msra.mxu0 %v7644_v31 }
 0x1c3   : > { %5945 = vmatprep.subr.mxu1 %v7598_v16  ;;  %5918 = vmatprep.subr.mxu0 %v7652_v19 }
 0x1c4   : > { %5946 = vmatpush3.msra.mxu1 %v7598_v16  ;;  %5919 = vmatpush3.msra.mxu0 %v7652_v19 }
 0x1c5   : > { %5947 = vmatprep.subr.mxu1 %v7600_v17  ;;  %5920 = vmatprep.subr.mxu0 %v7666_v10 }
 0x1c6   : > { %5948 = vmatpush3.msra.mxu1 %v7600_v17  ;;  %5921 = vmatpush3.msra.mxu0 %v7666_v10 }
 0x1c7   : > { %5949 = vmatprep.subr.mxu1 %v7602_v18  ;;  %5922 = vmatprep.subr.mxu0 %v7678_v28 }
 0x1c8   : > { %5950 = vmatpush3.msra.mxu1 %v7602_v18  ;;  %5923 = vmatpush3.msra.mxu0 %v7678_v28 }
 0x1c9   : > { %5951 = vmatprep.subr.mxu1 %v7613_v43  ;;  %5924 = vmatprep.subr.mxu0 %v7690_v34 }
 0x1ca   : > { %5952 = vmatpush3.msra.mxu1 %v7613_v43  ;;  %5925 = vmatpush3.msra.mxu0 %v7690_v34 }
 0x1cb   : > { %5953 = vmatprep.subr.mxu1 %v7631_v15  ;;  %5926 = vmatprep.subr.mxu0 %v7699_v42 }
 0x1cc   : > { %5954 = vmatpush3.msra.mxu1 %v7631_v15  ;;  %5927 = vmatpush3.msra.mxu0 %v7699_v42 }
 0x1cd   : > { %5955 = vmatprep.subr.mxu1 %v7649_v45  ;;  %5928 = vmatprep.mubr.f32.mxu0 %v8623_v59 }
 0x1ce   : > { %5956 = vmatpush3.msra.mxu1 %v7649_v45  ;;  %5966 = vmatprep.subr.mxu0 %v7542_v7 }
 0x1cf   : > { %5957 = vmatprep.subr.mxu1 %v7663_v2  ;;  %5929 = vmatmul.mubr.f32.vlgmr.msra.gmra.mxu0 %v7333_v39 }
 0x1d0   : > { %5958 = vmatpush3.msra.mxu1 %v7663_v2  ;;  %5967 = vmatpush3.msra.mxu0 %v7542_v7 }
 0x1d1   : > { %5959 = vmatprep.subr.mxu1 %v7675_v44  ;;  %5963 = vmatprep.mubr.f32.mxu1 %v8584_v36 }
 0x1d2   : > { %5960 = vmatpush3.msra.mxu1 %v7675_v44  ;;  %5968 = vmatprep.subr.mxu0 %v7554_v9 }
 0x1d3   : > { %5961 = vmatprep.subr.mxu1 %v7686_v24  ;;  %5969 = vmatpush3.msra.mxu0 %v7554_v9 }
 0x1d4   : > { %5962 = vmatpush3.msra.mxu1 %v7686_v24  ;;  %5970 = vmatprep.subr.mxu0 %v7566_v38 }
 0x1d5   : > { %6001 = vmatprep.subr.mxu1 %v7531_v62  ;;  %5964 = vmatmul.mubr.f32.vlgmr.msra.gmra.mxu1 %v7344_v40 }
 0x1d6   : > { %6002 = vmatpush3.msra.mxu1 %v7531_v62  ;;  %5971 = vmatpush3.msra.mxu0 %v7566_v38 }
 0x1d7   : > { %6003 = vmatprep.subr.mxu1 %v7534_v22  ;;  %5972 = vmatprep.subr.mxu0 %v7583_v20 }
 0x1d8   : > { %6004 = vmatpush3.msra.mxu1 %v7534_v22  ;;  %5973 = vmatpush3.msra.mxu0 %v7583_v20 }
 0x1d9   : > { %6005 = vmatprep.subr.mxu1 %v7544_v29  ;;  %5974 = vmatprep.subr.mxu0 %v7588_v4 }
 0x1da   : > { %6006 = vmatpush3.msra.mxu1 %v7544_v29  ;;  %5975 = vmatpush3.msra.mxu0 %v7588_v4 }
 0x1db   : > { %6007 = vmatprep.subr.mxu1 %v7556_v21  ;;  %5976 = vmatprep.subr.mxu0 %v7608_v3 }
 0x1dc   : > { %6008 = vmatpush3.msra.mxu1 %v7556_v21  ;;  %5977 = vmatpush3.msra.mxu0 %v7608_v3  ;;  %v8625_v21 = vld [vmem:[#allocation17_spill] sm:$0xff] }
 0x1dd   : > { %6009 = vmatprep.subr.mxu1 %v7568_v52  ;;  %5978 = vmatprep.subr.mxu0 %v7629_v0  ;;  %v8626_v3 = vld [vmem:[#allocation13_spill] sm:$0xff] }
 0x1de   : > { %6010 = vmatpush3.msra.mxu1 %v7568_v52  ;;  %5979 = vmatpush3.msra.mxu0 %v7629_v0  ;;  %v334_v13 = vsub.s32 2, %v8626_v3 }
 0x1df   : > { %6011 = vmatprep.subr.mxu1 %v7577_v30  ;;  %5980 = vmatprep.subr.mxu0 %v7635_v1 }
 0x1e0   : > { %6012 = vmatpush3.msra.mxu1 %v7577_v30  ;;  %5981 = vmatpush3.msra.mxu0 %v7635_v1 }
 0x1e1   : > { %6013 = vmatprep.subr.mxu1 %v7590_v5  ;;  %5982 = vmatprep.subr.mxu0 %v7638_v37 }
 0x1e2   : > { %6014 = vmatpush3.msra.mxu1 %v7590_v5  ;;  %5983 = vmatpush3.msra.mxu0 %v7638_v37 }
 0x1e3   : > { %6015 = vmatprep.subr.mxu1 %v7598_v16  ;;  %5984 = vmatprep.subr.mxu0 %v7641_v14 }
 0x1e4   : > { %6016 = vmatpush3.msra.mxu1 %v7598_v16  ;;  %5985 = vmatpush3.msra.mxu0 %v7641_v14 }
 0x1e5   : > { %6017 = vmatprep.subr.mxu1 %v7600_v17  ;;  %5986 = vmatprep.subr.mxu0 %v7660_v41 }
 0x1e6   : > { %6018 = vmatpush3.msra.mxu1 %v7600_v17  ;;  %5987 = vmatpush3.msra.mxu0 %v7660_v41 }
 0x1e7   : > { %6019 = vmatprep.subr.mxu1 %v7602_v18  ;;  %5988 = vmatprep.subr.mxu0 %v7672_v61 }
 0x1e8   : > { %6020 = vmatpush3.msra.mxu1 %v7602_v18  ;;  %5989 = vmatpush3.msra.mxu0 %v7672_v61 }
 0x1e9   : > { %6021 = vmatprep.subr.mxu1 %v7613_v43  ;;  %5990 = vmatprep.subr.mxu0 %v7684_v27 }
 0x1ea   : > { %6022 = vmatpush3.msra.mxu1 %v7613_v43  ;;  %5991 = vmatpush3.msra.mxu0 %v7684_v27 }
 0x1eb   : > { %6023 = vmatprep.subr.mxu1 %v7631_v15  ;;  %5992 = vmatprep.subr.mxu0 %v7696_v56 }
 0x1ec   : > { %6024 = vmatpush3.msra.mxu1 %v7631_v15  ;;  %5993 = vmatpush3.msra.mxu0 %v7696_v56  ;;  %v8627_v15 = vld [vmem:[#allocation14_spill] sm:$0xff] }
 0x1ed   : > { %6025 = vmatprep.subr.mxu1 %v7649_v45  ;;  %5994 = vmatprep.subr.mxu0 %v7706_v25  ;;  %v335_v1 = vrot.slane %v8627_v15, %v334_v13 }
 0x1ee   : > { %6026 = vmatpush3.msra.mxu1 %v7649_v45  ;;  %5995 = vmatpush3.msra.mxu0 %v7706_v25 }
 0x1ef   : > { %6027 = vmatprep.subr.mxu1 %v7663_v2  ;;  %5996 = vmatprep.subr.mxu0 %v7713_v12 }
 0x1f0   : > { %6028 = vmatpush3.msra.mxu1 %v7663_v2  ;;  %5997 = vmatpush3.msra.mxu0 %v7713_v12 }
 0x1f1   : > { %6029 = vmatprep.subr.mxu1 %v7675_v44  ;;  %5998 = vmatprep.mubr.f32.mxu0 %v8615_v51 }
 0x1f2   : > { %6030 = vmatpush3.msra.mxu1 %v7675_v44  ;;  %5999 = vmatmul.mubr.f32.vlgmr.msra.gmra.mxu0 %v7322_v57 }
 0x1f3   : > { %6031 = vmatprep.subr.mxu1 %v7686_v24  ;;  %6033 = vmatprep.mubr.f32.mxu1 %v8615_v51 }
 0x1f4   : > { %6032 = vmatpush3.msra.mxu1 %v7686_v24 }
 0x1f5   : > { %6034 = vmatmul.mubr.f32.vlgmr.msra.gmra.mxu1 %v7322_v57 }
 0x21e   : > { %v1937_v39 = vpop.xlane.xlu1 %1936 }
 0x21f   : > { %v1942_v40 = vmul.f32 0.015625, %v1937_v39 }
 0x221   : > { %v1944_v47 = vsub.f32 %v7515_v23, %v1942_v40 }
 0x222   : > { %v1940_v36 = vpop.xlane.xlu1 %1939 }
 0x223   : > { %v1943_v62 = vmul.f32 0.015625, %v1940_v36  ;;  %v1946_v35 = vmul.f32 %v1944_v47, %v1944_v47 }
 0x224   : > { %v1967_v42 = vpop.xlane.xlu0 %1966 }
 0x225   : > { %v1969_v56 = vmul.f32 0.015625, %v1967_v42  ;;  %v7864_v9 = vsub.f32 %v8624_v33, %v1943_v62  ;;  %v1948_v49 = vsel %vm1934_vm0, %v1946_v35, 0.0 }
 0x227   : > { %v1971_v22 = vsub.f32 %v7521_v50, %v1969_v56  ;;  %v1947_v30 = vmul.f32 %v7864_v9, %v7864_v9 }
 0x228   : > { %v1964_v48 = vpop.xlane.xlu0 %1963 }
 0x229   : > { %v1968_v7 = vmul.f32 0.015625, %v1964_v48  ;;  %v1973_v29 = vmul.f32 %v1971_v22, %v1971_v22  ;;  %v1951_v32 = vsel %vm1934_vm0, %v1947_v30, 0.0 }
 0x22b   : > { %v1970_v51 = vsub.f32 %v8625_v21, %v1968_v7  ;;  %v1977_v57 = vsel %vm1934_vm0, %v1973_v29, 0.0 }
 0x22c   : > { %1978 = vadd.xlane.f32.xlu0 %v1977_v57 }
 0x22d   : > { %v1972_v38 = vmul.f32 %v1970_v51, %v1970_v51 }
 0x22f   : > { %v1974_v52 = vsel %vm1934_vm0, %v1972_v38, 0.0 }
 0x230   : > { %1975 = vadd.xlane.f32.xlu1 %v1974_v52  ;;  %1949 = vadd.xlane.f32.xlu0 %v1948_v49 }
 0x234   : > { %1952 = vadd.xlane.f32.xlu1 %v1951_v32 }
 0x26c   : > { %v5860_v0 = vpop.f32.mrf.mxu0 }
 0x26d   : > { %v1341_v45 = vadd.f32 %v5860_v0, %v335_v1 }
 0x26e   : > { %v1330_v14 = vpop.f32.mrf.mxu0 }
 0x26f   : > { %v1331_v19 = vadd.f32 %v1330_v14, %v335_v1 }
 0x275   : > { %v5895_v31 = vpop.f32.mrf.mxu1 }
 0x276   : > { %v1498_v61 = vadd.f32 %v5895_v31, %v1341_v45 }
 0x277   : > { %v1491_v41 = vpop.f32.mrf.mxu1 }
 0x278   : > { %v1492_v28 = vadd.f32 %v1491_v41, %v1331_v19 }
 0x28f   : > { %v5930_v2 = vpop.f32.mrf.mxu0 }
 0x290   : > { %v1609_v12 = vadd.f32 %v5930_v2, %v1498_v61 }
 0x291   : > { %v1601_v24 = vpop.f32.mrf.mxu0 }
 0x292   : > { %v1602_v46 = vadd.f32 %v1601_v24, %v1492_v28 }
 0x295   : > { %v5965_v34 = vpop.f32.mrf.mxu1 }
 0x296   : > { %v1706_v56 = vadd.f32 %v5965_v34, %v1609_v12 }
 0x297   : > { %v1697_v59 = vpop.f32.mrf.mxu1 }
 0x298   : > { %v1698_v7 = vadd.f32 %v1697_v59, %v1602_v46 }
 0x2b2   : > { %v6000_v57 = vpop.f32.mrf.mxu0 }
 0x2b3   : > { %v1831_v49 = vadd.f32 %v6000_v57, %v1706_v56 }
 0x2b4   : > { %v1824_v30 = vpop.f32.mrf.mxu0 }
 0x2b5   : > { %v1979_v20 = vpop.xlane.xlu0 %1978  ;;  %v6035_v32 = vpop.f32.mrf.mxu1 }
 0x2b6   : > { %v1981_v4 = vmul.f32 0.015625, %v1979_v20 }
 0x2b8   : > { %v1983_v5 = vadd.f32 1e-06, %v1981_v4 }
 0x2b9   : > { %v1950_v6 = vpop.xlane.xlu0 %1949  ;;  %v1976_v16 = vpop.xlane.xlu1 %1975 }
 0x2ba   : > { %6507 = vrsqrt.f32 %v1983_v5  ;;  %v1954_v17 = vmul.f32 0.015625, %v1950_v6  ;;  %v1980_v18 = vmul.f32 0.015625, %v1976_v16  ;;  %v1825_v5 = vadd.f32 %v1824_v30, %v1698_v7 }
 0x2bb   : > { %v7894_v6 = vadd.f32 %v6035_v32, %v1831_v49 }
 0x2bc   : > { %v1956_v43 = vadd.f32 1e-06, %v1954_v17  ;;  %v1982_v53 = vadd.f32 1e-06, %v1980_v18  ;;  %v1917_v17 = vpop.f32.mrf.mxu1 }
 0x2bd   : > { %v1953_v54 = vpop.xlane.xlu1 %1952 }
 0x2be   : > { %6509 = vrsqrt.f32 %v1956_v43  ;;  %v1955_v58 = vmul.f32 0.015625, %v1953_v54  ;;  %v7899_v54 = vadd.f32 %v1917_v17, %v1825_v5 }
 0x2bf   : > { %6511 = vrsqrt.f32 %v1982_v53  ;;  %v7897_v53 = vand.u32 4294901760, %v7894_v6 }
 0x2c0   : > { %v1957_v37 = vadd.f32 1e-06, %v1955_v58  ;;  %v7907_v15 = vand.u32 4294901760, %v7899_v54 }
 0x2c1   : > { %v7904_v0 = vsub.f32 %v7894_v6, %v7897_v53 }
 0x2c2   : > { %6513 = vrsqrt.f32 %v1957_v37  ;;  %v7913_v1 = vsub.f32 %v7899_v54, %v7907_v15 }
 0x2c3   : > { %v7916_v37 = vand.u32 4294901760, %v7904_v0 }
 0x2c4   : > { %v7923_v31 = vand.u32 4294901760, %v7913_v1 }
 0x2c5   : > { %v2648_v14 = vsub.f32 %v7904_v0, %v7916_v37 }
 0x2c6   : > { %v2655_v19 = vsub.f32 %v7913_v1, %v7923_v31 }
 0x2c7   : > { %v6508_v10 = vpop.eup %6507  ;;  %v2649_v45 = vand.u32 4294901760, %v2648_v14 }
 0x2c8   : > { %v1987_v44 = vmul.f32 %v6508_v10, %v1971_v22  ;;  %v2656_v41 = vand.u32 4294901760, %v2655_v19 }
 0x2ca   : > { %v1998_v27 = vsel %vm1934_vm0, %v1987_v44, 0 }
 0x2cb   : > { %v6510_v25 = vpop.eup %6509  ;;  %v7876_v11 = vand.u32 4294901760, %v1998_v27 }
 0x2cc   : > { %v6512_v63 = vpop.eup %6511  ;;  %v1960_v8 = vmul.f32 %v6510_v25, %v1944_v47 }
 0x2cd   : > { %v1986_v26 = vmul.f32 %v6512_v63, %v1970_v51  ;;  %6036 = vmatprep.subr.mxu0 %v7876_v11  ;;  %v2117_v55 = vsub.f32 %v1998_v27, %v7876_v11 }
 0x2ce   : > { %6037 = vmatpush3.xpose.msra.mxu0 %v7876_v11  ;;  %v1989_v60 = vsel %vm1934_vm0, %v1960_v8, 0 }
 0x2cf   : > { %v6514_v39 = vpop.eup %6513  ;;  %v1995_v40 = vsel %vm1934_vm0, %v1986_v26, 0  ;;  %v7883_v36 = vand.u32 4294901760, %v1989_v60  ;;  %v2118_v42 = vand.u32 4294901760, %v2117_v55 }
 0x2d0   : > { %v7885_v62 = vand.u32 4294901760, %v1995_v40  ;;  %v1961_v47 = vmul.f32 %v6514_v39, %v7864_v9 }
 0x2d1   : > { %6047 = vmatprep.mubr.f32.mxu1 %v7883_v36  ;;  %v2119_v22 = vsub.f32 %v2117_v55, %v2118_v42  ;;  %v2068_v48 = vsub.f32 %v1989_v60, %v7883_v36 }
 0x2d2   : > { %6038 = vmatprep.subr.mxu0 %v7885_v62  ;;  %v2124_v29 = vsub.f32 %v1995_v40, %v7885_v62  ;;  %v1992_v51 = vsel %vm1934_vm0, %v1961_v47, 0 }
 0x2d3   : > { %6039 = vmatpush3.xpose.msra.mxu0 %v7885_v62  ;;  %v2120_v35 = vand.u32 4294901760, %v2119_v22  ;;  %v2069_v38 = vand.u32 4294901760, %v2068_v48  ;;  %v2077_v52 = vand.u32 4294901760, %v1992_v51 }
 0x2d4   : > { %6050 = vmatprep.subr.mxu0 %v2117_v55  ;;  %v2125_v9 = vand.u32 4294901760, %v2124_v29 }
 0x2d5   : > { %6043 = vmatprep.subr.mxu1 %v2120_v35  ;;  %v2070_v20 = vsub.f32 %v2068_v48, %v2069_v38  ;;  %v2078_v4 = vsub.f32 %v1992_v51, %v2077_v52 }
 0x2d6   : > { %6044 = vmatpush3.xpose.msra.mxu1 %v2120_v35  ;;  %v2126_v16 = vsub.f32 %v2124_v29, %v2125_v9 }
 0x2d7   : > { %v2071_v18 = vand.u32 4294901760, %v2070_v20  ;;  %v2079_v3 = vand.u32 4294901760, %v2078_v4 }
 0x2d8   : > { %v2127_v13 = vand.u32 4294901760, %v2126_v16 }
 0x2d9   : > { %6040 = vmatprep.mubr.f32.mxu0 %v2071_v18  ;;  %v2080_v43 = vsub.f32 %v2078_v4, %v2079_v3 }
 0x2da   : > { %6045 = vmatprep.subr.mxu1 %v2127_v13 }
 0x2db   : > { %6046 = vmatpush3.xpose.msra.mxu1 %v2127_v13  ;;  %v2081_v58 = vand.u32 4294901760, %v2080_v43 }
 0x2dc   : > { %6057 = vmatprep.subr.mxu1 %v7876_v11 }
 0x2dd   : > { %6041 = vmatmul.mubr.f32.vlgmr.msra.gmra.mxu0 %v2081_v58 }
 0x2de   : > { %6048 = vmatmul.mubr.f32.vlgmr.msra.gmra.mxu1 %v2077_v52  ;;  %6051 = vmatpush3.xpose.msra.mxu0 %v2117_v55 }
 0x2df   : > { %6052 = vmatprep.subr.mxu0 %v2124_v29  ;;  %6054 = vmatprep.mubr.f32.mxu0 %v2068_v48 }
 0x2e0   : > { %6058 = vmatpush3.xpose.msra.mxu1 %v7876_v11  ;;  %6061 = vmatprep.mubr.f32.mxu1 %v2069_v38 }
 0x2e1   : > { %6059 = vmatprep.subr.mxu1 %v7885_v62 }
 0x2e2   : > { %6053 = vmatpush3.xpose.msra.mxu0 %v2124_v29 }
 0x2e3   : > { %6064 = vmatprep.subr.mxu0 %v2118_v42 }
 0x2e4   : > { %6060 = vmatpush3.xpose.msra.mxu1 %v7885_v62 }
 0x2e5   : > { %6071 = vmatprep.subr.mxu1 %v7876_v11  ;;  %6055 = vmatmul.mubr.f32.vlgmr.msra.gmra.mxu0 %v2078_v4 }
 0x2e6   : > { %6065 = vmatpush3.xpose.msra.mxu0 %v2118_v42  ;;  %6068 = vmatprep.mubr.f32.mxu0 %v7883_v36 }
 0x2e7   : > { %6062 = vmatmul.mubr.f32.vlgmr.msra.gmra.mxu1 %v2079_v3  ;;  %6066 = vmatprep.subr.mxu0 %v2125_v9 }
 0x2e8   : > { %6072 = vmatpush3.xpose.msra.mxu1 %v7876_v11  ;;  %6075 = vmatprep.mubr.f32.mxu1 %v7883_v36 }
 0x2e9   : > { %6073 = vmatprep.subr.mxu1 %v7885_v62 }
 0x2ea   : > { %6067 = vmatpush3.xpose.msra.mxu0 %v2125_v9 }
 0x2eb   : > { %6078 = vmatprep.subr.mxu0 %v7897_v53 }
 0x2ec   : > { %6074 = vmatpush3.xpose.msra.mxu1 %v7885_v62 }
 0x2ed   : > { %6069 = vmatmul.mubr.f32.vlgmr.msra.gmra.mxu0 %v2077_v52  ;;  %6085 = vmatprep.subr.mxu1 %v2649_v45 }
 0x2ee   : > { %6079 = vmatpush3.msra.mxu0 %v7897_v53 }
 0x2ef   : > { %6076 = vmatmul.mubr.f32.vlgmr.msra.gmra.mxu1 %v2077_v52  ;;  %6080 = vmatprep.subr.mxu0 %v7907_v15 }
 0x2f0   : > { %6086 = vmatpush3.msra.mxu1 %v2649_v45  ;;  %6081 = vmatpush3.msra.mxu0 %v7907_v15 }
 0x2f1   : > { %6087 = vmatprep.subr.mxu1 %v2656_v41  ;;  %6092 = vmatprep.subr.mxu0 %v7904_v0 }
 0x2f2   : > { %6088 = vmatpush3.msra.mxu1 %v2656_v41 }
 0x2f3   : > { %6099 = vmatprep.subr.mxu1 %v7897_v53 }
 0x39d   : > { %v6042_v2 = vpop.f32.mrf.mxu0 }
 0x39e   : > { %v6049_v10 = vpop.f32.mrf.mxu1 }
 0x39f   : > { %v2073_v61 = vpop.f32.mrf.mxu0  ;;  %v2171_v27 = vadd.f32 %v6049_v10, %v6042_v2 }
 0x3a0   : > { %v2164_v44 = vpop.f32.mrf.mxu1 }
 0x3a1   : > { %v2165_v25 = vadd.f32 %v2164_v44, %v2073_v61 }
 0x3a5   : > { %v6056_v28 = vpop.f32.mrf.mxu0 }
 0x3a6   : > { %v2254_v11 = vadd.f32 %v6056_v28, %v2171_v27 }
 0x3a7   : > { %v6063_v24 = vpop.f32.mrf.mxu1  ;;  %v2246_v34 = vpop.f32.mrf.mxu0 }
 0x3a8   : > { %v2247_v12 = vadd.f32 %v2246_v34, %v2165_v25  ;;  %v2337_v8 = vadd.f32 %v6063_v24, %v2254_v11 }
 0x3a9   : > { %v2328_v63 = vpop.f32.mrf.mxu1 }
 0x3aa   : > { %v2329_v55 = vadd.f32 %v2328_v63, %v2247_v12 }
 0x3ad   : > { %v6070_v26 = vpop.f32.mrf.mxu0 }
 0x3ae   : > { %v2420_v46 = vadd.f32 %v6070_v26, %v2337_v8 }
 0x3af   : > { %v6077_v60 = vpop.f32.mrf.mxu1  ;;  %v2413_v59 = vpop.f32.mrf.mxu0 }
 0x3b0   : > { %v2499_v39 = vadd.f32 %v6077_v60, %v2420_v46  ;;  %v2414_v40 = vadd.f32 %v2413_v59, %v2329_v55 }
 0x3b1   : > { %v2492_v36 = vpop.f32.mrf.mxu1 }
 0x3b2   : > { %v2503_v42 = vmul.f32 0.0078125, %v2499_v39  ;;  %v2493_v56 = vadd.f32 %v2492_v36, %v2414_v40  ;;  %v3042_v39 = vld [vmem:[#allocation7 + $0x38] sm:$0xff]  ;;  %v3041_v36 = vld [vmem:[#allocation7 + $0x30] sm:$0xff] }
 0x3b3   : > { %v8006_v40 = vand.u32 4294901760, %v3042_v39 }
 0x3b4   : > { %v2502_v62 = vmul.f32 0.0078125, %v2493_v56  ;;  %v2508_v47 = vsel %vm2504_vm1, %v2503_v42, -inf  ;;  %v8011_v56 = vand.u32 4294901760, %v3041_v36 }
 0x3b5   : > { %2509 = vmax.xlane.f32.xlu1 %v2508_v47 }
 0x3b6   : > { %v2505_v22 = vsel %vm2504_vm1, %v2502_v62, -inf }
 0x3b7   : > { %2506 = vmax.xlane.f32.xlu0 %v2505_v22  ;;  %v8019_v22 = vsub.f32 %v3041_v36, %v8011_v56 }
 0x3c6   : > { %3675 = vrot.lane.b32.xlu1 %v8625_v21, %s6697_s14 }
 0x3ca   : > { %3633 = vrot.lane.b32.xlu1 %v7515_v23, %s6697_s14 }
 0x3cd   : > { %3677 = vrot.lane.b32.xlu0 %v7521_v50, %s6697_s14 }
 0x3ce   : > { %3635 = vrot.lane.b32.xlu1 %v8624_v33, %s6697_s14 }
 0x43e   : > { %v2510_v48 = vpop.xlane.xlu1 %2509 }
 0x43f   : > { %v2512_v7 = vsub.f32 %v2503_v42, %v2510_v48  ;;  %v8009_v42 = vsub.f32 %v3042_v39, %v8006_v40 }
 0x440   : > { %v2507_v29 = vpop.xlane.xlu0 %2506 }
 0x441   : > { %v2515_v51 = vmul.f32 1.442695, %v2512_v7  ;;  %v2511_v57 = vsub.f32 %v2502_v62, %v2507_v29  ;;  %v3040_v62 = vld [vmem:[#allocation7 + $0x28] sm:$0xff]  ;;  %v8016_v47 = vand.u32 4294901760, %v8009_v42  ;;  %v3039_v7 = vld [vmem:[#allocation7 + $0x20] sm:$0xff] }
 0x442   : > { %v3676_v35 = vpop.permute.xlu1 %3675  ;;  %v8021_v48 = vand.u32 4294901760, %v3040_v62 }
 0x443   : > { %6515 = vpow2.f32 %v2515_v51  ;;  %v2513_v38 = vmul.f32 1.442695, %v2511_v57  ;;  %v3681_v52 = vsel %vm1934_vm0, %v3676_v35, 0.0  ;;  %v3162_v29 = vsub.f32 %v8009_v42, %v8016_v47 }
 0x444   : > { %3682 = vadd.xlane.f32.xlu1 %v3681_v52  ;;  %v3678_v49 = vpop.permute.xlu0 %3677  ;;  %v8028_v51 = vand.u32 4294901760, %v8019_v22  ;;  %v8031_v57 = vsub.f32 %v3040_v62, %v8021_v48  ;;  %v8033_v35 = vand.u32 4294901760, %v3039_v7 }
 0x445   : > { %6517 = vpow2.f32 %v2513_v38  ;;  %v3684_v9 = vsel %vm1934_vm0, %v3678_v49, 0.0  ;;  %v3038_v38 = vld [vmem:[#allocation7 + $0x18] sm:$0xff]  ;;  %v3163_v52 = vand.u32 4294901760, %v3162_v29 }
 0x446   : > { %v3634_v30 = vpop.permute.xlu1 %3633  ;;  %3685 = vadd.xlane.f32.xlu0 %v3684_v9  ;;  %v3169_v49 = vsub.f32 %v8019_v22, %v8028_v51  ;;  %v8040_v9 = vand.u32 4294901760, %v8031_v57 }
 0x447   : > { %v3639_v32 = vsel %vm1934_vm0, %v3634_v30, 0.0  ;;  %v8043_v30 = vsub.f32 %v3039_v7, %v8033_v35 }
 0x44a   : > { %v3636_v20 = vpop.permute.xlu1 %3635  ;;  %3640 = vadd.xlane.f32.xlu0 %v3639_v32  ;;  %v8046_v32 = vand.u32 4294901760, %v3038_v38 }
 0x44b   : > { %v3642_v4 = vsel %vm1934_vm0, %v3636_v20, 0.0  ;;  %v3037_v20 = vld [vmem:[#allocation7 + $0x10] sm:$0xff] }
 0x44e   : > { %3643 = vadd.xlane.f32.xlu0 %v3642_v4  ;;  %v3170_v4 = vand.u32 4294901760, %v3169_v49 }
 0x450   : > { %v7952_v5 = vpop.eup %6515 }
 0x451   : > { %v2527_v16 = vsel %vm2504_vm1, %v7952_v5, 0  ;;  %v2520_v26 = vsel %vm2504_vm1, %v7952_v5, 0.0  ;;  %v3176_v5 = vsub.f32 %v8031_v57, %v8040_v9 }
 0x452   : > { %v7956_v17 = vpop.eup %6517  ;;  %v2606_v18 = vand.u32 4294901760, %v2527_v16 }
 0x453   : > { %v2524_v3 = vsel %vm2504_vm1, %v7956_v17, 0  ;;  %v2517_v59 = vsel %vm2504_vm1, %v7956_v17, 0.0  ;;  %v8054_v17 = vand.u32 4294901760, %v3037_v20 }
 0x454   : > { %v2596_v13 = vand.u32 4294901760, %v2524_v3  ;;  %v2607_v43 = vsub.f32 %v2527_v16, %v2606_v18  ;;  %v8052_v16 = vand.u32 4294901760, %v8043_v30 }
 0x456   : > { %6089 = vmatprep.mubr.f32.mxu1 %v2596_v13  ;;  %v2597_v58 = vsub.f32 %v2524_v3, %v2596_v13  ;;  %v2608_v14 = vand.u32 4294901760, %v2607_v43  ;;  %v3036_v3 = vld [vmem:[#allocation7 + $0x8] sm:$0xff] }
 0x457   : > { %6090 = vmatmul.mubr.f32.vlgmr.msra.gmra.mxu1 %v2606_v18 }
 0x458   : > { %6100 = vmatpush3.msra.mxu1 %v7897_v53  ;;  %v2598_v45 = vand.u32 4294901760, %v2597_v58  ;;  %v2609_v19 = vsub.f32 %v2607_v43, %v2608_v14 }
 0x459   : > { %6101 = vmatprep.subr.mxu1 %v7907_v15 }
 0x45a   : > { %6102 = vmatpush3.msra.mxu1 %v7907_v15  ;;  %6103 = vmatprep.mubr.f32.mxu1 %v2598_v45  ;;  %v2599_v41 = vsub.f32 %v2597_v58, %v2598_v45  ;;  %v2610_v10 = vand.u32 4294901760, %v2609_v19  ;;  %v3035_v19 = vld [vmem:[#allocation7] sm:$0xff] }
 0x45b   : > { %6113 = vmatprep.subr.mxu1 %v7897_v53  ;;  %6104 = vmatmul.mubr.f32.vlgmr.msra.gmra.mxu1 %v2608_v14  ;;  %v8065_v14 = vand.u32 4294901760, %v3036_v3 }
 0x45c   : > { %6114 = vmatpush3.msra.mxu1 %v7897_v53  ;;  %6117 = vmatprep.mubr.f32.mxu1 %v2596_v13  ;;  %v2600_v2 = vand.u32 4294901760, %v2599_v41 }
 0x45d   : > { %6115 = vmatprep.subr.mxu1 %v7907_v15 }
 0x45e   : > { %6116 = vmatpush3.msra.mxu1 %v7907_v15  ;;  %6082 = vmatprep.mubr.f32.mxu0 %v2600_v2 }
 0x45f   : > { %6083 = vmatmul.mubr.f32.vlgmr.msra.gmra.mxu0 %v2610_v10  ;;  %6118 = vmatmul.mubr.f32.vlgmr.msra.gmra.mxu1 %v2606_v18  ;;  %v8076_v10 = vsub.f32 %v3036_v3, %v8065_v14 }
 0x460   : > { %6093 = vmatpush3.msra.mxu0 %v7904_v0  ;;  %6096 = vmatprep.mubr.f32.mxu0 %v2597_v58  ;;  %v8063_v58 = vsub.f32 %v3037_v20, %v8054_v17 }
 0x461   : > { %6094 = vmatprep.subr.mxu0 %v7913_v1  ;;  %6139 = vmatprep.subr.mxu1 %v3163_v52 }
 0x462   : > { %6095 = vmatpush3.msra.mxu0 %v7913_v1  ;;  %6140 = vmatpush3.msra.mxu1 %v3163_v52  ;;  %v8073_v2 = vand.u32 4294901760, %v8063_v58 }
 0x463   : > { %6106 = vmatprep.subr.mxu0 %v7916_v37  ;;  %6097 = vmatmul.mubr.f32.vlgmr.msra.gmra.mxu0 %v2607_v43  ;;  %v3183_v43 = vsub.f32 %v8043_v30, %v8052_v16 }
 0x464   : > { %6107 = vmatpush3.msra.mxu0 %v7916_v37  ;;  %6110 = vmatprep.mubr.f32.mxu0 %v2596_v13  ;;  %v3177_v13 = vand.u32 4294901760, %v3176_v5 }
 0x465   : > { %6108 = vmatprep.subr.mxu0 %v7923_v31  ;;  %6141 = vmatprep.subr.mxu1 %v3170_v4  ;;  %v3184_v41 = vand.u32 4294901760, %v3183_v43 }
 0x466   : > { %6109 = vmatpush3.msra.mxu0 %v7923_v31  ;;  %6142 = vmatpush3.msra.mxu1 %v3170_v4 }
 0x467   : > { %6111 = vmatmul.mubr.f32.vlgmr.msra.gmra.mxu0 %v2606_v18  ;;  %6120 = vmatprep.subr.mxu0 %v8006_v40  ;;  %v8057_v18 = vsub.f32 %v3038_v38, %v8046_v32 }
 0x468   : > { %6121 = vmatpush3.msra.mxu0 %v8006_v40  ;;  %6143 = vmatprep.subr.mxu1 %v3177_v13 }
 0x469   : > { %6122 = vmatprep.subr.mxu0 %v8011_v56  ;;  %v8069_v45 = vand.u32 4294901760, %v8057_v18  ;;  %6144 = vmatpush3.msra.mxu1 %v3177_v13 }
 0x46a   : > { %6123 = vmatpush3.msra.mxu0 %v8011_v56  ;;  %6145 = vmatprep.subr.mxu1 %v3184_v41 }
 0x46b   : > { %6124 = vmatprep.subr.mxu0 %v8021_v48  ;;  %6146 = vmatpush3.msra.mxu1 %v3184_v41 }
 0x46c   : > { %6125 = vmatpush3.msra.mxu0 %v8021_v48 }
 0x46d   : > { %6126 = vmatprep.subr.mxu0 %v8033_v35 }
 0x46e   : > { %6127 = vmatpush3.msra.mxu0 %v8033_v35 }
 0x46f   : > { %6128 = vmatprep.subr.mxu0 %v8046_v32 }
 0x470   : > { %6129 = vmatpush3.msra.mxu0 %v8046_v32 }
 0x471   : > { %6130 = vmatprep.subr.mxu0 %v8054_v17 }
 0x472   : > { %6131 = vmatpush3.msra.mxu0 %v8054_v17 }
 0x473   : > { %6132 = vmatprep.subr.mxu0 %v8065_v14 }
 0x474   : > { %6133 = vmatpush3.msra.mxu0 %v8065_v14 }
 0x4cd   : > { %v3683_v53 = vpop.xlane.xlu1 %3682 }
 0x4ce   : > { %v3687_v15 = vmul.f32 0.015625, %v3683_v53  ;;  %v8078_v53 = vand.u32 4294901760, %v3035_v19 }
 0x4cf   : > { %v3686_v61 = vpop.xlane.xlu0 %3685 }
 0x4d0   : > { %v7975_v0 = vsub.f32 %v8625_v21, %v3687_v15  ;;  %v3688_v44 = vmul.f32 0.015625, %v3686_v61  ;;  %v3190_v15 = vsub.f32 %v8057_v18, %v8069_v45  ;;  %v3197_v61 = vsub.f32 %v8063_v58, %v8073_v2  ;;  %6134 = vmatprep.subr.mxu0 %v8078_v53 }
 0x4d1   : > { %6135 = vmatpush3.msra.mxu0 %v8078_v53 }
 0x4d2   : > { %v7978_v1 = vsub.f32 %v7521_v50, %v3688_v44  ;;  %v3691_v28 = vmul.f32 %v7975_v0, %v7975_v0  ;;  %v8087_v44 = vand.u32 4294901760, %v8076_v10  ;;  %6158 = vmatprep.subr.mxu0 %v8009_v42 }
 0x4d3   : > { %v3641_v37 = vpop.xlane.xlu0 %3640 }
 0x4d4   : > { %v3645_v27 = vmul.f32 0.015625, %v3641_v37  ;;  %3695 = vrot.lane.b32.xlu1 %v3691_v28, %s6697_s14  ;;  %v3692_v31 = vmul.f32 %v7978_v1, %v7978_v1  ;;  %v8090_v28 = vsub.f32 %v3035_v19, %v8078_v53  ;;  %v3191_v37 = vand.u32 4294901760, %v3190_v15 }
 0x4d6   : > { %v7986_v24 = vsub.f32 %v7515_v23, %v3645_v27  ;;  %3697 = vrot.lane.b32.xlu0 %v3692_v31, %s6697_s14  ;;  %v3198_v27 = vand.u32 4294901760, %v3197_v61  ;;  %v3204_v31 = vsub.f32 %v8076_v10, %v8087_v44  ;;  %6147 = vmatprep.subr.mxu1 %v3191_v37 }
 0x4d7   : > { %v3644_v21 = vpop.xlane.xlu0 %3643  ;;  %6148 = vmatpush3.msra.mxu1 %v3191_v37 }
 0x4d8   : > { %v3646_v34 = vmul.f32 0.015625, %v3644_v21  ;;  %v3649_v50 = vmul.f32 %v7986_v24, %v7986_v24  ;;  %v8097_v21 = vand.u32 4294901760, %v8090_v28  ;;  %6149 = vmatprep.subr.mxu1 %v3198_v27 }
 0x4d9   : > { %6150 = vmatpush3.msra.mxu1 %v3198_v27 }
 0x4da   : > { %v7992_v25 = vsub.f32 %v8624_v33, %v3646_v34  ;;  %3653 = vrot.lane.b32.xlu1 %v3649_v50, %s6697_s14  ;;  %v3205_v34 = vand.u32 4294901760, %v3204_v31  ;;  %v3211_v50 = vsub.f32 %v8090_v28, %v8097_v21 }
 0x4dc   : > { %v3650_v11 = vmul.f32 %v7992_v25, %v7992_v25  ;;  %6151 = vmatprep.subr.mxu1 %v3205_v34 }
 0x4dd   : > { %6152 = vmatpush3.msra.mxu1 %v3205_v34 }
 0x4de   : > { %3655 = vrot.lane.b32.xlu1 %v3650_v11, %s6697_s14  ;;  %v3212_v11 = vand.u32 4294901760, %v3211_v50 }
 0x4e0   : > { %6153 = vmatprep.subr.mxu1 %v3212_v11 }
 0x4e1   : > { %6154 = vmatpush3.msra.mxu1 %v3212_v11 }
 0x4e2   : > { %6177 = vmatprep.subr.mxu1 %v8006_v40 }
 0x546   : > { %v3696_v12 = vpop.permute.xlu1 %3695 }
 0x547   : > { %v3701_v23 = vsel %vm1934_vm0, %v3696_v12, 0.0  ;;  %v6084_v12 = vpop.f32.mrf.mxu0 }
 0x548   : > { %3702 = vadd.xlane.f32.xlu1 %v3701_v23  ;;  %v3698_v63 = vpop.permute.xlu0 %3697 }
 0x549   : > { %v3704_v8 = vsel %vm1934_vm0, %v3698_v63, 0.0  ;;  %v2602_v23 = vpop.f32.mrf.mxu0 }
 0x54a   : > { %3705 = vadd.xlane.f32.xlu0 %v3704_v8  ;;  %v6091_v8 = vpop.f32.mrf.mxu1 }
 0x54c   : > { %v3654_v33 = vpop.permute.xlu1 %3653  ;;  %2521 = vadd.xlane.f32.xlu1 %v2520_v26  ;;  %v2693_v36 = vpop.f32.mrf.mxu1 }
 0x54d   : > { %v3659_v55 = vsel %vm1934_vm0, %v3654_v33, 0.0  ;;  %v2694_v41 = vadd.f32 %v2693_v36, %v2602_v23 }
 0x54e   : > { %3660 = vadd.xlane.f32.xlu0 %v3659_v55  ;;  %v6098_v55 = vpop.f32.mrf.mxu0  ;;  %v6105_v49 = vpop.f32.mrf.mxu1 }
 0x550   : > { %v3656_v46 = vpop.permute.xlu1 %3655  ;;  %v2775_v38 = vpop.f32.mrf.mxu0 }
 0x551   : > { %v3662_v60 = vsel %vm1934_vm0, %v3656_v46, 0.0  ;;  %v2857_v43 = vpop.f32.mrf.mxu1  ;;  %v2776_v37 = vadd.f32 %v2775_v38, %v2694_v41 }
 0x552   : > { %3663 = vadd.xlane.f32.xlu0 %v3662_v60  ;;  %v6112_v3 = vpop.f32.mrf.mxu0 }
 0x553   : > { %v6119_v27 = vpop.f32.mrf.mxu1 }
 0x556   : > { %2518 = vadd.xlane.f32.xlu0 %v2517_v59  ;;  %v2700_v59 = vadd.f32 %v6091_v8, %v6084_v12 }
 0x558   : > { %v2783_v7 = vadd.f32 %v6098_v55, %v2700_v59 }
 0x55a   : > { %v2866_v4 = vadd.f32 %v6105_v49, %v2783_v7 }
 0x55c   : > { %v2949_v15 = vadd.f32 %v6112_v3, %v2866_v4 }
 0x55e   : > { %v3028_v34 = vadd.f32 %v6119_v27, %v2949_v15 }
 0x5d1   : > { %v3703_v63 = vpop.xlane.xlu1 %3702 }
 0x5d2   : > { %v3707_v26 = vmul.f32 0.015625, %v3703_v63  ;;  %v2858_v63 = vadd.f32 %v2857_v43, %v2776_v37 }
 0x5d3   : > { %v3706_v33 = vpop.xlane.xlu0 %3705 }
 0x5d4   : > { %v3709_v46 = vadd.f32 1e-06, %v3707_v26  ;;  %v3708_v60 = vmul.f32 0.015625, %v3706_v33  ;;  %v2942_v26 = vpop.f32.mrf.mxu0 }
 0x5d5   : > { %v2522_v39 = vpop.xlane.xlu1 %2521 }
 0x5d6   : > { %6519 = vrsqrt.f32 %v3709_v46  ;;  %v3710_v62 = vadd.f32 1e-06, %v3708_v60  ;;  %v2943_v46 = vadd.f32 %v2942_v26, %v2858_v63 }
 0x5d7   : > { %6521 = vrcp.f32 %v2522_v39  ;;  %v3661_v29 = vpop.xlane.xlu0 %3660  ;;  %v3021_v39 = vpop.f32.mrf.mxu1 }
 0x5d8   : > { %6523 = vrsqrt.f32 %v3710_v62  ;;  %v3665_v52 = vmul.f32 0.015625, %v3661_v29  ;;  %v3022_v36 = vadd.f32 %v3021_v39, %v2943_v46 }
 0x5da   : > { %v3667_v20 = vadd.f32 1e-06, %v3665_v52 }
 0x5db   : > { %v3664_v5 = vpop.xlane.xlu0 %3663 }
 0x5dc   : > { %6525 = vrsqrt.f32 %v3667_v20  ;;  %v3666_v13 = vmul.f32 0.015625, %v3664_v5 }
 0x5de   : > { %v3668_v19 = vadd.f32 1e-06, %v3666_v13 }
 0x5df   : > { %v2519_v61 = vpop.xlane.xlu0 %2518 }
 0x5e0   : > { %6527 = vrsqrt.f32 %v3668_v19 }
 0x5e1   : > { %6529 = vrcp.f32 %v2519_v61 }
 0x5e3   : > { %v6520_v31 = vpop.eup %6519 }
 0x5e4   : > { %v6522_v50 = vpop.eup %6521  ;;  %v3713_v11 = vmul.f32 %v6520_v31, %v7975_v0 }
 0x5e5   : > { %v6524_v12 = vpop.eup %6523  ;;  %v3034_v8 = vmul.f32 %v6522_v50, %v3028_v34 }
 0x5e6   : > { %3723 = vrot.lane.b32.xlu1 %v3713_v11, %s6697_s14  ;;  %v3714_v33 = vmul.f32 %v6524_v12, %v7978_v1 }
 0x5e7   : > { %v3047_v23 = vsel %vm1934_vm0, %v3034_v8, 0 }
 0x5e8   : > { %3725 = vrot.lane.b32.xlu0 %v3714_v33, %s6697_s14  ;;  %v8110_v59 = vand.u32 4294901760, %v3047_v23 }
 0x5e9   : > { %v6526_v55 = vpop.eup %6525 }
 0x5ea   : > { %v3671_v60 = vmul.f32 %v6526_v55, %v7986_v24  ;;  %v3133_v1 = vsub.f32 %v3047_v23, %v8110_v59 }
 0x5ec   : > { %3717 = vrot.lane.b32.xlu1 %v3671_v60, %s6697_s14  ;;  %v3134_v49 = vand.u32 4294901760, %v3133_v1 }
 0x5ed   : > { %v6528_v0 = vpop.eup %6527 }
 0x5ee   : > { %v6530_v62 = vpop.eup %6529  ;;  %v3672_v7 = vmul.f32 %v6528_v0, %v7992_v25  ;;  %v3135_v4 = vsub.f32 %v3133_v1, %v3134_v49 }
 0x5ef   : > { %v3033_v29 = vmul.f32 %v6530_v62, %v3022_v36 }
 0x5f0   : > { %3719 = vrot.lane.b32.xlu1 %v3672_v7, %s6697_s14  ;;  %v3136_v3 = vand.u32 4294901760, %v3135_v4 }
 0x5f1   : > { %v3044_v38 = vsel %vm1934_vm0, %v3033_v29, 0 }
 0x5f2   : > { %v3122_v52 = vand.u32 4294901760, %v3044_v38 }
 0x5f4   : > { %6155 = vmatprep.mubr.f32.mxu1 %v3122_v52  ;;  %v3123_v24 = vsub.f32 %v3044_v38, %v3122_v52 }
 0x5f5   : > { %6156 = vmatmul.mubr.f32.vlgmr.msra.gmra.mxu1 %v8110_v59 }
 0x5f6   : > { %6178 = vmatpush3.msra.mxu1 %v8006_v40  ;;  %v3124_v20 = vand.u32 4294901760, %v3123_v24 }
 0x5f7   : > { %6179 = vmatprep.subr.mxu1 %v8011_v56 }
 0x5f8   : > { %6180 = vmatpush3.msra.mxu1 %v8011_v56  ;;  %6193 = vmatprep.mubr.f32.mxu1 %v3124_v20  ;;  %v3125_v25 = vsub.f32 %v3123_v24, %v3124_v20 }
 0x5f9   : > { %6181 = vmatprep.subr.mxu1 %v8021_v48 }
 0x5fa   : > { %6182 = vmatpush3.msra.mxu1 %v8021_v48  ;;  %v3126_v5 = vand.u32 4294901760, %v3125_v25 }
 0x5fb   : > { %6183 = vmatprep.subr.mxu1 %v8033_v35 }
 0x5fc   : > { %6184 = vmatpush3.msra.mxu1 %v8033_v35  ;;  %6136 = vmatprep.mubr.f32.mxu0 %v3126_v5 }
 0x5fd   : > { %6185 = vmatprep.subr.mxu1 %v8046_v32  ;;  %6137 = vmatmul.mubr.f32.vlgmr.msra.gmra.mxu0 %v3136_v3 }
 0x5fe   : > { %6159 = vmatpush3.msra.mxu0 %v8009_v42  ;;  %6186 = vmatpush3.msra.mxu1 %v8046_v32 }
 0x5ff   : > { %6160 = vmatprep.subr.mxu0 %v8019_v22  ;;  %6174 = vmatprep.mubr.f32.mxu0 %v3123_v24 }
 0x600   : > { %6187 = vmatprep.subr.mxu1 %v8054_v17  ;;  %6161 = vmatpush3.msra.mxu0 %v8019_v22 }
 0x601   : > { %6188 = vmatpush3.msra.mxu1 %v8054_v17  ;;  %6162 = vmatprep.subr.mxu0 %v8031_v57 }
 0x602   : > { %6189 = vmatprep.subr.mxu1 %v8065_v14  ;;  %6163 = vmatpush3.msra.mxu0 %v8031_v57 }
 0x603   : > { %6190 = vmatpush3.msra.mxu1 %v8065_v14  ;;  %6164 = vmatprep.subr.mxu0 %v8043_v30 }
 0x604   : > { %6191 = vmatprep.subr.mxu1 %v8078_v53  ;;  %6165 = vmatpush3.msra.mxu0 %v8043_v30 }
 0x605   : > { %6192 = vmatpush3.msra.mxu1 %v8078_v53  ;;  %6166 = vmatprep.subr.mxu0 %v8057_v18 }
 0x606   : > { %6194 = vmatmul.mubr.f32.vlgmr.msra.gmra.mxu1 %v3134_v49  ;;  %6215 = vmatprep.subr.mxu1 %v8006_v40 }
 0x607   : > { %6167 = vmatpush3.msra.mxu0 %v8057_v18  ;;  %6216 = vmatpush3.msra.mxu1 %v8006_v40 }
 0x608   : > { %6231 = vmatprep.mubr.f32.mxu1 %v3122_v52  ;;  %6168 = vmatprep.subr.mxu0 %v8063_v58 }
 0x609   : > { %6217 = vmatprep.subr.mxu1 %v8011_v56  ;;  %6169 = vmatpush3.msra.mxu0 %v8063_v58 }
 0x60a   : > { %6218 = vmatpush3.msra.mxu1 %v8011_v56  ;;  %6170 = vmatprep.subr.mxu0 %v8076_v10 }
 0x60b   : > { %6219 = vmatprep.subr.mxu1 %v8021_v48  ;;  %6171 = vmatpush3.msra.mxu0 %v8076_v10 }
 0x60c   : > { %6220 = vmatpush3.msra.mxu1 %v8021_v48  ;;  %6172 = vmatprep.subr.mxu0 %v8090_v28 }
 0x60d   : > { %6221 = vmatprep.subr.mxu1 %v8033_v35  ;;  %6173 = vmatpush3.msra.mxu0 %v8090_v28 }
 0x60e   : > { %6222 = vmatpush3.msra.mxu1 %v8033_v35  ;;  %6175 = vmatmul.mubr.f32.vlgmr.msra.gmra.mxu0 %v3133_v1 }
 0x60f   : > { %6196 = vmatprep.subr.mxu0 %v8016_v47  ;;  %6223 = vmatprep.subr.mxu1 %v8046_v32 }
 0x610   : > { %6197 = vmatpush3.msra.mxu0 %v8016_v47  ;;  %6212 = vmatprep.mubr.f32.mxu0 %v3122_v52 }
 0x611   : > { %6224 = vmatpush3.msra.mxu1 %v8046_v32  ;;  %6198 = vmatprep.subr.mxu0 %v8028_v51 }
 0x612   : > { %6225 = vmatprep.subr.mxu1 %v8054_v17  ;;  %6199 = vmatpush3.msra.mxu0 %v8028_v51 }
 0x613   : > { %6226 = vmatpush3.msra.mxu1 %v8054_v17  ;;  %6200 = vmatprep.subr.mxu0 %v8040_v9 }
 0x614   : > { %6227 = vmatprep.subr.mxu1 %v8065_v14  ;;  %6201 = vmatpush3.msra.mxu0 %v8040_v9 }
 0x615   : > { %6228 = vmatpush3.msra.mxu1 %v8065_v14  ;;  %6202 = vmatprep.subr.mxu0 %v8052_v16 }
 0x616   : > { %6229 = vmatprep.subr.mxu1 %v8078_v53  ;;  %6203 = vmatpush3.msra.mxu0 %v8052_v16 }
 0x617   : > { %6230 = vmatpush3.msra.mxu1 %v8078_v53  ;;  %6204 = vmatprep.subr.mxu0 %v8069_v45 }
 0x618   : > { %6232 = vmatmul.mubr.f32.vlgmr.msra.gmra.mxu1 %v8110_v59  ;;  %6205 = vmatpush3.msra.mxu0 %v8069_v45 }
 0x619   : > { %6206 = vmatprep.subr.mxu0 %v8073_v2 }
 0x61a   : > { %6207 = vmatpush3.msra.mxu0 %v8073_v2 }
 0x61b   : > { %6208 = vmatprep.subr.mxu0 %v8087_v44 }
 0x61c   : > { %6209 = vmatpush3.msra.mxu0 %v8087_v44 }
 0x61d   : > { %6210 = vmatprep.subr.mxu0 %v8097_v21 }
 0x61e   : > { %6211 = vmatpush3.msra.mxu0 %v8097_v21 }
 0x61f   : > { %6213 = vmatmul.mubr.f32.vlgmr.msra.gmra.mxu0 %v8110_v59 }
 0x658   : > { %v3724_v40 = vpop.permute.xlu1 %3723 }
 0x659   : > { %v3731_v42 = vsel %vm1934_vm0, %v3724_v40, 0 }
 0x65a   : > { %v3767_v56 = vand.u32 4294901760, %v3731_v42  ;;  %v3726_v47 = vpop.permute.xlu0 %3725 }
 0x65b   : > { %v3733_v22 = vsel %vm1934_vm0, %v3726_v47, 0 }
 0x65c   : > { %v3859_v48 = vsub.f32 %v3731_v42, %v3767_v56  ;;  %v3764_v51 = vand.u32 4294901760, %v3733_v22 }
 0x65e   : > { %v3852_v57 = vsub.f32 %v3733_v22, %v3764_v51  ;;  %v3718_v35 = vpop.permute.xlu1 %3717  ;;  %6234 = vmatprep.subr.mxu0 %v3764_v51  ;;  %v3860_v9 = vand.u32 4294901760, %v3859_v48 }
 0x65f   : > { %v3727_v30 = vsel %vm1934_vm0, %v3718_v35, 0  ;;  %6235 = vmatpush3.xpose.msra.mxu0 %v3764_v51 }
 0x660   : > { %v3802_v32 = vand.u32 4294901760, %v3727_v30  ;;  %6236 = vmatprep.subr.mxu0 %v3767_v56  ;;  %v3853_v16 = vand.u32 4294901760, %v3852_v57  ;;  %v3861_v14 = vsub.f32 %v3859_v48, %v3860_v9 }
 0x662   : > { %v3803_v17 = vsub.f32 %v3727_v30, %v3802_v32  ;;  %v3720_v18 = vpop.permute.xlu1 %3719  ;;  %6245 = vmatprep.mubr.f32.mxu1 %v3802_v32  ;;  %v3854_v58 = vsub.f32 %v3852_v57, %v3853_v16  ;;  %v3862_v28 = vand.u32 4294901760, %v3861_v14 }
 0x663   : > { %v3729_v45 = vsel %vm1934_vm0, %v3720_v18, 0  ;;  %6237 = vmatpush3.xpose.msra.mxu0 %v3767_v56 }
 0x664   : > { %v3804_v2 = vand.u32 4294901760, %v3803_v17  ;;  %v3812_v10 = vand.u32 4294901760, %v3729_v45  ;;  %6248 = vmatprep.subr.mxu0 %v3852_v57  ;;  %v3855_v53 = vand.u32 4294901760, %v3854_v58 }
 0x666   : > { %v3813_v44 = vsub.f32 %v3729_v45, %v3812_v10  ;;  %6241 = vmatprep.subr.mxu1 %v3855_v53  ;;  %v3805_v21 = vsub.f32 %v3803_v17, %v3804_v2 }
 0x667   : > { %6242 = vmatpush3.xpose.msra.mxu1 %v3855_v53 }
 0x668   : > { %v3814_v13 = vand.u32 4294901760, %v3813_v44  ;;  %6243 = vmatprep.subr.mxu1 %v3862_v28  ;;  %v3806_v43 = vand.u32 4294901760, %v3805_v21 }
 0x66a   : > { %v3815_v19 = vsub.f32 %v3813_v44, %v3814_v13  ;;  %6238 = vmatprep.mubr.f32.mxu0 %v3806_v43 }
 0x66b   : > { %6244 = vmatpush3.xpose.msra.mxu1 %v3862_v28 }
 0x66c   : > { %v3816_v41 = vand.u32 4294901760, %v3815_v19  ;;  %6255 = vmatprep.subr.mxu1 %v3764_v51 }
 0x66e   : > { %6239 = vmatmul.mubr.f32.vlgmr.msra.gmra.mxu0 %v3816_v41  ;;  %6246 = vmatmul.mubr.f32.vlgmr.msra.gmra.mxu1 %v3812_v10 }
 0x66f   : > { %6249 = vmatpush3.xpose.msra.mxu0 %v3852_v57  ;;  %6252 = vmatprep.mubr.f32.mxu0 %v3803_v17 }
 0x670   : > { %6250 = vmatprep.subr.mxu0 %v3859_v48  ;;  %6256 = vmatpush3.xpose.msra.mxu1 %v3764_v51 }
 0x671   : > { %6259 = vmatprep.mubr.f32.mxu1 %v3804_v2  ;;  %6257 = vmatprep.subr.mxu1 %v3767_v56 }
 0x673   : > { %6251 = vmatpush3.xpose.msra.mxu0 %v3859_v48 }
 0x674   : > { %6258 = vmatpush3.xpose.msra.mxu1 %v3767_v56  ;;  %6262 = vmatprep.subr.mxu0 %v3853_v16 }
 0x675   : > { %6269 = vmatprep.subr.mxu1 %v3764_v51 }
 0x676   : > { %6253 = vmatmul.mubr.f32.vlgmr.msra.gmra.mxu0 %v3813_v44 }
 0x677   : > { %6260 = vmatmul.mubr.f32.vlgmr.msra.gmra.mxu1 %v3814_v13  ;;  %6263 = vmatpush3.xpose.msra.mxu0 %v3853_v16 }
 0x678   : > { %6266 = vmatprep.mubr.f32.mxu0 %v3802_v32  ;;  %6264 = vmatprep.subr.mxu0 %v3860_v9 }
 0x679   : > { %6270 = vmatpush3.xpose.msra.mxu1 %v3764_v51  ;;  %6273 = vmatprep.mubr.f32.mxu1 %v3802_v32 }
 0x67a   : > { %6271 = vmatprep.subr.mxu1 %v3767_v56 }
 0x67b   : > { %6265 = vmatpush3.xpose.msra.mxu0 %v3860_v9 }
 0x67d   : > { %6272 = vmatpush3.xpose.msra.mxu1 %v3767_v56 }
 0x67e   : > { %6267 = vmatmul.mubr.f32.vlgmr.msra.gmra.mxu0 %v3812_v10 }
 0x680   : > { %6274 = vmatmul.mubr.f32.vlgmr.msra.gmra.mxu1 %v3812_v10 }
 0x6b5   : > { %v6157_v15 = vpop.f32.mrf.mxu1 }
 0x6b7   : > { %v3249_v27 = vpop.f32.mrf.mxu1 }
 0x6bd   : > { %v6138_v61 = vpop.f32.mrf.mxu0 }
 0x6be   : > { %v3256_v37 = vadd.f32 %v6157_v15, %v6138_v61 }
 0x6bf   : > { %v3128_v31 = vpop.f32.mrf.mxu0 }
 0x6c0   : > { %v3250_v34 = vadd.f32 %v3249_v27, %v3128_v31 }
 0x6c6   : > { %v6195_v50 = vpop.f32.mrf.mxu1 }
 0x6c8   : > { %v3431_v33 = vpop.f32.mrf.mxu1 }
 0x6ce   : > { %v6176_v11 = vpop.f32.mrf.mxu0 }
 0x6cf   : > { %v3351_v12 = vadd.f32 %v6176_v11, %v3256_v37 }
 0x6d0   : > { %v3343_v63 = vpop.f32.mrf.mxu0 }
 0x6d1   : > { %v3344_v8 = vadd.f32 %v3343_v63, %v3250_v34  ;;  %v3440_v26 = vadd.f32 %v6195_v50, %v3351_v12 }
 0x6d3   : > { %v8186_v23 = vadd.f32 %v3431_v33, %v3344_v8 }
 0x6d8   : > { %v6233_v60 = vpop.f32.mrf.mxu1 }
 0x6da   : > { %v8192_v0 = vpop.f32.mrf.mxu1 }
 0x6df   : > { %v6214_v55 = vpop.f32.mrf.mxu0 }
 0x6e0   : > { %v3541_v46 = vadd.f32 %v6214_v55, %v3440_v26 }
 0x6e1   : > { %v8190_v39 = vpop.f32.mrf.mxu0 }
 0x6e2   : > { %v8188_v59 = vadd.f32 %v6233_v60, %v3541_v46 }
 0x72e   : > { %v6240_v36 = vpop.f32.mrf.mxu0  ;;  %v6247_v62 = vpop.f32.mrf.mxu1 }
 0x72f   : > { %v3906_v38 = vadd.f32 %v6247_v62, %v6240_v36  ;;  %v4784_v36 = vld [vmem:[#allocation7 + $0x78] sm:$0xff] }
 0x730   : > { %v3808_v7 = vpop.f32.mrf.mxu0  ;;  %v3899_v29 = vpop.f32.mrf.mxu1  ;;  %v8204_v62 = vand.u32 4294901760, %v4784_v36 }
 0x731   : > { %v3900_v24 = vadd.f32 %v3899_v29, %v3808_v7  ;;  %v4783_v7 = vld [vmem:[#allocation7 + $0x70] sm:$0xff] }
 0x732   : > { %v8207_v29 = vsub.f32 %v4784_v36, %v8204_v62 }
 0x736   : > { %v6254_v1 = vpop.f32.mrf.mxu0 }
 0x737   : > { %v6261_v52 = vpop.f32.mrf.mxu1  ;;  %v3989_v20 = vadd.f32 %v6254_v1, %v3906_v38  ;;  %v8209_v1 = vand.u32 4294901760, %v4783_v7  ;;  %v4782_v38 = vld [vmem:[#allocation7 + $0x68] sm:$0xff] }
 0x738   : > { %v3981_v49 = vpop.f32.mrf.mxu0 }
 0x739   : > { %v3982_v4 = vadd.f32 %v3981_v49, %v3900_v24  ;;  %v4063_v25 = vpop.f32.mrf.mxu1  ;;  %v4072_v5 = vadd.f32 %v6261_v52, %v3989_v20  ;;  %v8214_v52 = vand.u32 4294901760, %v8207_v29  ;;  %v8217_v49 = vsub.f32 %v4783_v7, %v8209_v1  ;;  %v4781_v20 = vld [vmem:[#allocation7 + $0x60] sm:$0xff] }
 0x73a   : > { %v8219_v24 = vand.u32 4294901760, %v4782_v38 }
 0x73b   : > { %v4064_v40 = vadd.f32 %v4063_v25, %v3982_v4  ;;  %v4904_v4 = vsub.f32 %v8207_v29, %v8214_v52  ;;  %v8226_v25 = vand.u32 4294901760, %v8217_v49 }
 0x73e   : > { %v6268_v3 = vpop.f32.mrf.mxu0 }
 0x73f   : > { %v4155_v42 = vadd.f32 %v6268_v3, %v4072_v5  ;;  %v8229_v5 = vsub.f32 %v4782_v38, %v8219_v24  ;;  %v8231_v3 = vand.u32 4294901760, %v4781_v20 }
 0x740   : > { %v6275_v56 = vpop.f32.mrf.mxu1  ;;  %v4148_v47 = vpop.f32.mrf.mxu0 }
 0x741   : > { %v4234_v22 = vadd.f32 %v6275_v56, %v4155_v42  ;;  %v4149_v48 = vadd.f32 %v4148_v47, %v4064_v40  ;;  %v4780_v40 = vld [vmem:[#allocation7 + $0x58] sm:$0xff]  ;;  %v4905_v42 = vand.u32 4294901760, %v4904_v4  ;;  %v4911_v56 = vsub.f32 %v8217_v49, %v8226_v25 }
 0x742   : > { %v4227_v51 = vpop.f32.mrf.mxu1  ;;  %v8238_v47 = vand.u32 4294901760, %v8229_v5 }
 0x743   : > { %v4238_v57 = vmul.f32 0.0078125, %v4234_v22  ;;  %v4228_v35 = vadd.f32 %v4227_v51, %v4149_v48  ;;  %v8241_v22 = vsub.f32 %v4781_v20, %v8231_v3  ;;  %v8244_v48 = vand.u32 4294901760, %v4780_v40  ;;  %v4779_v51 = vld [vmem:[#allocation7 + $0x50] sm:$0xff] }
 0x745   : > { %v4237_v9 = vmul.f32 0.0078125, %v4228_v35  ;;  %v4242_v30 = vsel %vm2504_vm1, %v4238_v57, -inf  ;;  %v4918_v35 = vsub.f32 %v8229_v5, %v8238_v47 }
 0x746   : > { %4243 = vmax.xlane.f32.xlu1 %v4242_v30  ;;  %v8252_v30 = vand.u32 4294901760, %v4779_v51 }
 0x747   : > { %v4239_v32 = vsel %vm2504_vm1, %v4237_v9, -inf }
 0x748   : > { %4240 = vmax.xlane.f32.xlu0 %v4239_v32  ;;  %v8255_v32 = vsub.f32 %v4780_v40, %v8244_v48 }
 0x757   : > { %4259 = vrot.lane.b32.xlu1 %v7899_v54, %s6697_s14 }
 0x75e   : > { %4261 = vrot.lane.b32.xlu0 %v7894_v6, %s6697_s14 }
 0x7cf   : > { %v4244_v16 = vpop.xlane.xlu1 %4243 }
 0x7d0   : > { %v4246_v17 = vsub.f32 %v4238_v57, %v4244_v16  ;;  %v4912_v57 = vand.u32 4294901760, %v4911_v56  ;;  %v4778_v16 = vld [vmem:[#allocation7 + $0x48] sm:$0xff] }
 0x7d1   : > { %v4241_v18 = vpop.xlane.xlu0 %4240 }
 0x7d2   : > { %v4249_v58 = vmul.f32 1.442695, %v4246_v17  ;;  %v4245_v14 = vsub.f32 %v4237_v9, %v4241_v18  ;;  %v8250_v9 = vand.u32 4294901760, %v8241_v22  ;;  %v4919_v17 = vand.u32 4294901760, %v4918_v35 }
 0x7d3   : > { %v4260_v45 = vpop.permute.xlu1 %4259 }
 0x7d4   : > { %6531 = vpow2.f32 %v4249_v58  ;;  %v4247_v2 = vmul.f32 1.442695, %v4245_v14  ;;  %v4303_v10 = vand.u32 4294901760, %v4260_v45  ;;  %v4925_v18 = vsub.f32 %v8241_v22, %v8250_v9 }
 0x7d5   : > { %v4262_v53 = vpop.permute.xlu0 %4261  ;;  %v8261_v58 = vsub.f32 %v4779_v51, %v8252_v30  ;;  %v8263_v14 = vand.u32 4294901760, %v4778_v16 }
 0x7d6   : > { %6533 = vpow2.f32 %v4247_v2  ;;  %v4395_v44 = vsub.f32 %v4260_v45, %v4303_v10  ;;  %v4300_v28 = vand.u32 4294901760, %v4262_v53  ;;  %v8267_v45 = vand.u32 4294901760, %v8255_v32  ;;  %v4777_v2 = vld [vmem:[#allocation7 + $0x40] sm:$0xff] }
 0x7d8   : > { %v4388_v21 = vsub.f32 %v4262_v53, %v4300_v28  ;;  %6276 = vmatprep.subr.mxu0 %v4300_v28  ;;  %v4396_v13 = vand.u32 4294901760, %v4395_v44  ;;  %v8271_v53 = vand.u32 4294901760, %v8261_v58 }
 0x7d9   : > { %6277 = vmatpush3.msra.mxu0 %v4300_v28 }
 0x7da   : > { %6278 = vmatprep.subr.mxu0 %v4303_v10  ;;  %v4389_v54 = vand.u32 4294901760, %v4388_v21  ;;  %v4397_v43 = vsub.f32 %v4395_v44, %v4396_v13 }
 0x7db   : > { %6279 = vmatpush3.msra.mxu0 %v4303_v10 }
 0x7dc   : > { %6290 = vmatprep.subr.mxu0 %v4388_v21  ;;  %v4390_v6 = vsub.f32 %v4388_v21, %v4389_v54  ;;  %v4398_v41 = vand.u32 4294901760, %v4397_v43 }
 0x7de   : > { %v4391_v19 = vand.u32 4294901760, %v4390_v6 }
 0x7e0   : > { %6283 = vmatprep.subr.mxu1 %v4391_v19 }
 0x7e1   : > { %v6532_v15 = vpop.eup %6531  ;;  %6284 = vmatpush3.msra.mxu1 %v4391_v19 }
 0x7e2   : > { %6285 = vmatprep.subr.mxu1 %v4398_v41  ;;  %v4254_v61 = vsel %vm2504_vm1, %v6532_v15, 0.0  ;;  %v4269_v37 = vsel %vm2504_vm1, %v6532_v15, 0 }
 0x7e3   : > { %v6534_v27 = vpop.eup %6533  ;;  %4255 = vadd.xlane.f32.xlu1 %v4254_v61  ;;  %6286 = vmatpush3.msra.mxu1 %v4398_v41  ;;  %v4348_v31 = vand.u32 4294901760, %v4269_v37 }
 0x7e4   : > { %6297 = vmatprep.subr.mxu1 %v4300_v28  ;;  %v4251_v34 = vsel %vm2504_vm1, %v6534_v27, 0.0  ;;  %v4266_v50 = vsel %vm2504_vm1, %v6534_v27, 0 }
 0x7e5   : > { %4252 = vadd.xlane.f32.xlu0 %v4251_v34  ;;  %v4338_v11 = vand.u32 4294901760, %v4266_v50  ;;  %v4349_v12 = vsub.f32 %v4269_v37, %v4348_v31 }
 0x7e7   : > { %6287 = vmatprep.mubr.f32.mxu1 %v4338_v11  ;;  %v4339_v63 = vsub.f32 %v4266_v50, %v4338_v11  ;;  %v4350_v8 = vand.u32 4294901760, %v4349_v12 }
 0x7e8   : > { %6288 = vmatmul.mubr.f32.vlgmr.msra.gmra.mxu1 %v4348_v31 }
 0x7e9   : > { %6298 = vmatpush3.msra.mxu1 %v4300_v28  ;;  %v4340_v26 = vand.u32 4294901760, %v4339_v63  ;;  %v4351_v33 = vsub.f32 %v4349_v12, %v4350_v8 }
 0x7ea   : > { %6299 = vmatprep.subr.mxu1 %v4303_v10 }
 0x7eb   : > { %6300 = vmatpush3.msra.mxu1 %v4303_v10  ;;  %6301 = vmatprep.mubr.f32.mxu1 %v4340_v26  ;;  %v4341_v55 = vsub.f32 %v4339_v63, %v4340_v26  ;;  %v4352_v60 = vand.u32 4294901760, %v4351_v33 }
 0x7ec   : > { %6311 = vmatprep.subr.mxu1 %v4300_v28  ;;  %6302 = vmatmul.mubr.f32.vlgmr.msra.gmra.mxu1 %v4350_v8 }
 0x7ed   : > { %6312 = vmatpush3.msra.mxu1 %v4300_v28  ;;  %6315 = vmatprep.mubr.f32.mxu1 %v4338_v11  ;;  %v4342_v46 = vand.u32 4294901760, %v4341_v55  ;;  %v8276_v28 = vand.u32 4294901760, %v4777_v2 }
 0x7ee   : > { %6313 = vmatprep.subr.mxu1 %v4303_v10 }
 0x7ef   : > { %6314 = vmatpush3.msra.mxu1 %v4303_v10  ;;  %6280 = vmatprep.mubr.f32.mxu0 %v4342_v46  ;;  %v4926_v10 = vand.u32 4294901760, %v4925_v18  ;;  %v8288_v6 = vsub.f32 %v4777_v2, %v8276_v28 }
 0x7f0   : > { %6281 = vmatmul.mubr.f32.vlgmr.msra.gmra.mxu0 %v4352_v60  ;;  %6316 = vmatmul.mubr.f32.vlgmr.msra.gmra.mxu1 %v4348_v31 }
 0x7f1   : > { %6291 = vmatpush3.msra.mxu0 %v4388_v21  ;;  %6294 = vmatprep.mubr.f32.mxu0 %v4339_v63  ;;  %v4932_v21 = vsub.f32 %v8255_v32, %v8267_v45  ;;  %v8295_v15 = vand.u32 4294901760, %v8288_v6 }
 0x7f2   : > { %6292 = vmatprep.subr.mxu0 %v4395_v44  ;;  %6337 = vmatprep.subr.mxu1 %v4905_v42 }
 0x7f3   : > { %6293 = vmatpush3.msra.mxu0 %v4395_v44  ;;  %6338 = vmatpush3.msra.mxu1 %v4905_v42  ;;  %v8274_v44 = vsub.f32 %v4778_v16, %v8263_v14  ;;  %v4933_v43 = vand.u32 4294901760, %v4932_v21  ;;  %v4953_v37 = vsub.f32 %v8288_v6, %v8295_v15 }
 0x7f4   : > { %6304 = vmatprep.subr.mxu0 %v4389_v54  ;;  %6295 = vmatmul.mubr.f32.vlgmr.msra.gmra.mxu0 %v4349_v12 }
 0x7f5   : > { %6305 = vmatpush3.msra.mxu0 %v4389_v54  ;;  %6308 = vmatprep.mubr.f32.mxu0 %v4338_v11  ;;  %v8285_v54 = vand.u32 4294901760, %v8274_v44  ;;  %v4954_v27 = vand.u32 4294901760, %v4953_v37 }
 0x7f6   : > { %6306 = vmatprep.subr.mxu0 %v4396_v13  ;;  %6339 = vmatprep.subr.mxu1 %v4912_v57 }
 0x7f7   : > { %6307 = vmatpush3.msra.mxu0 %v4396_v13  ;;  %6340 = vmatpush3.msra.mxu1 %v4912_v57  ;;  %v4939_v13 = vsub.f32 %v8261_v58, %v8271_v53  ;;  %v4946_v41 = vsub.f32 %v8274_v44, %v8285_v54 }
 0x7f8   : > { %6309 = vmatmul.mubr.f32.vlgmr.msra.gmra.mxu0 %v4348_v31  ;;  %6318 = vmatprep.subr.mxu0 %v8204_v62 }
 0x7f9   : > { %6319 = vmatpush3.msra.mxu0 %v8204_v62  ;;  %6341 = vmatprep.subr.mxu1 %v4919_v17  ;;  %v4940_v19 = vand.u32 4294901760, %v4939_v13  ;;  %v4947_v61 = vand.u32 4294901760, %v4946_v41 }
 0x7fa   : > { %6320 = vmatprep.subr.mxu0 %v8209_v1  ;;  %6342 = vmatpush3.msra.mxu1 %v4919_v17 }
 0x7fb   : > { %6321 = vmatpush3.msra.mxu0 %v8209_v1  ;;  %6343 = vmatprep.subr.mxu1 %v4926_v10 }
 0x7fc   : > { %6322 = vmatprep.subr.mxu0 %v8219_v24  ;;  %6344 = vmatpush3.msra.mxu1 %v4926_v10 }
 0x7fd   : > { %6323 = vmatpush3.msra.mxu0 %v8219_v24  ;;  %6345 = vmatprep.subr.mxu1 %v4933_v43 }
 0x7fe   : > { %6324 = vmatprep.subr.mxu0 %v8231_v3  ;;  %6346 = vmatpush3.msra.mxu1 %v4933_v43 }
 0x7ff   : > { %6325 = vmatpush3.msra.mxu0 %v8231_v3  ;;  %6347 = vmatprep.subr.mxu1 %v4940_v19 }
 0x800   : > { %6326 = vmatprep.subr.mxu0 %v8244_v48  ;;  %6348 = vmatpush3.msra.mxu1 %v4940_v19 }
 0x801   : > { %6327 = vmatpush3.msra.mxu0 %v8244_v48  ;;  %6349 = vmatprep.subr.mxu1 %v4947_v61 }
 0x802   : > { %6328 = vmatprep.subr.mxu0 %v8252_v30  ;;  %6350 = vmatpush3.msra.mxu1 %v4947_v61 }
 0x803   : > { %6329 = vmatpush3.msra.mxu0 %v8252_v30  ;;  %6351 = vmatprep.subr.mxu1 %v4954_v27 }
 0x804   : > { %6330 = vmatprep.subr.mxu0 %v8263_v14  ;;  %6352 = vmatpush3.msra.mxu1 %v4954_v27 }
 0x805   : > { %6331 = vmatpush3.msra.mxu0 %v8263_v14  ;;  %6375 = vmatprep.subr.mxu1 %v8204_v62 }
 0x806   : > { %6332 = vmatprep.subr.mxu0 %v8276_v28 }
 0x807   : > { %6333 = vmatpush3.msra.mxu0 %v8276_v28 }
 0x808   : > { %6356 = vmatprep.subr.mxu0 %v8207_v29 }
 0x86c   : > { %v4256_v34 = vpop.xlane.xlu1 %4255 }
 0x86d   : > { %6535 = vrcp.f32 %v4256_v34 }
 0x86e   : > { %v4253_v11 = vpop.xlane.xlu0 %4252 }
 0x86f   : > { %6537 = vrcp.f32 %v4253_v11 }
 0x87a   : > { %v6536_v35 = vpop.eup %6535 }
 0x87c   : > { %v6538_v2 = vpop.eup %6537 }
 0x8a8   : > { %v6289_v31 = vpop.f32.mrf.mxu1 }
 0x8aa   : > { %v4435_v50 = vpop.f32.mrf.mxu1 }
 0x8ac   : > { %v6303_v12 = vpop.f32.mrf.mxu1 }
 0x8ae   : > { %v4599_v33 = vpop.f32.mrf.mxu1 }
 0x8b0   : > { %v6282_v63 = vpop.f32.mrf.mxu0  ;;  %v6317_v20 = vpop.f32.mrf.mxu1 }
 0x8b1   : > { %v4442_v26 = vadd.f32 %v6289_v31, %v6282_v63 }
 0x8b2   : > { %v4344_v8 = vpop.f32.mrf.mxu0  ;;  %v4763_v16 = vpop.f32.mrf.mxu1 }
 0x8b3   : > { %v4436_v46 = vadd.f32 %v4435_v50, %v4344_v8 }
 0x8b4   : > { %v6296_v55 = vpop.f32.mrf.mxu0 }
 0x8b5   : > { %v4525_v60 = vadd.f32 %v6296_v55, %v4442_v26 }
 0x8b6   : > { %v4517_v36 = vpop.f32.mrf.mxu0 }
 0x8b7   : > { %v4518_v7 = vadd.f32 %v4517_v36, %v4436_v46  ;;  %v4608_v38 = vadd.f32 %v6303_v12, %v4525_v60 }
 0x8b8   : > { %v6310_v4 = vpop.f32.mrf.mxu0 }
 0x8b9   : > { %v4691_v40 = vadd.f32 %v6310_v4, %v4608_v38  ;;  %v4600_v42 = vadd.f32 %v4599_v33, %v4518_v7 }
 0x8ba   : > { %v4684_v56 = vpop.f32.mrf.mxu0 }
 0x8bb   : > { %v4770_v51 = vadd.f32 %v6317_v20, %v4691_v40  ;;  %v4685_v57 = vadd.f32 %v4684_v56, %v4600_v42 }
 0x8bd   : > { %v4776_v17 = vmul.f32 %v6536_v35, %v4770_v51  ;;  %v4764_v18 = vadd.f32 %v4763_v16, %v4685_v57 }
 0x8bf   : > { %v4789_v10 = vsel %vm1934_vm0, %v4776_v17, 0  ;;  %v4775_v21 = vmul.f32 %v6538_v2, %v4764_v18 }
 0x8c0   : > { %v8303_v13 = vand.u32 4294901760, %v4789_v10 }
 0x8c1   : > { %v4786_v43 = vsel %vm1934_vm0, %v4775_v21, 0 }
 0x8c2   : > { %v4875_v19 = vsub.f32 %v4789_v10, %v8303_v13  ;;  %v4864_v41 = vand.u32 4294901760, %v4786_v43 }
 0x8c4   : > { %v4865_v61 = vsub.f32 %v4786_v43, %v4864_v41  ;;  %6353 = vmatprep.mubr.f32.mxu1 %v4864_v41  ;;  %v4876_v37 = vand.u32 4294901760, %v4875_v19 }
 0x8c5   : > { %6354 = vmatmul.mubr.f32.vlgmr.msra.gmra.mxu1 %v8303_v13 }
 0x8c6   : > { %6376 = vmatpush3.msra.mxu1 %v8204_v62  ;;  %v4866_v27 = vand.u32 4294901760, %v4865_v61  ;;  %v4877_v31 = vsub.f32 %v4875_v19, %v4876_v37 }
 0x8c7   : > { %6377 = vmatprep.subr.mxu1 %v8209_v1 }
 0x8c8   : > { %6378 = vmatpush3.msra.mxu1 %v8209_v1  ;;  %6391 = vmatprep.mubr.f32.mxu1 %v4866_v27  ;;  %v4867_v34 = vsub.f32 %v4865_v61, %v4866_v27  ;;  %v4878_v11 = vand.u32 4294901760, %v4877_v31 }
 0x8c9   : > { %6379 = vmatprep.subr.mxu1 %v8219_v24 }
 0x8ca   : > { %6380 = vmatpush3.msra.mxu1 %v8219_v24  ;;  %v4868_v50 = vand.u32 4294901760, %v4867_v34 }
 0x8cb   : > { %6381 = vmatprep.subr.mxu1 %v8231_v3 }
 0x8cc   : > { %6382 = vmatpush3.msra.mxu1 %v8231_v3  ;;  %6334 = vmatprep.mubr.f32.mxu0 %v4868_v50 }
 0x8cd   : > { %6383 = vmatprep.subr.mxu1 %v8244_v48  ;;  %6335 = vmatmul.mubr.f32.vlgmr.msra.gmra.mxu0 %v4878_v11 }
 0x8ce   : > { %6357 = vmatpush3.msra.mxu0 %v8207_v29  ;;  %6384 = vmatpush3.msra.mxu1 %v8244_v48 }
 0x8cf   : > { %6358 = vmatprep.subr.mxu0 %v8217_v49  ;;  %6372 = vmatprep.mubr.f32.mxu0 %v4865_v61 }
 0x8d0   : > { %6385 = vmatprep.subr.mxu1 %v8252_v30  ;;  %6359 = vmatpush3.msra.mxu0 %v8217_v49 }
 0x8d1   : > { %6386 = vmatpush3.msra.mxu1 %v8252_v30  ;;  %6360 = vmatprep.subr.mxu0 %v8229_v5 }
 0x8d2   : > { %6387 = vmatprep.subr.mxu1 %v8263_v14  ;;  %6361 = vmatpush3.msra.mxu0 %v8229_v5 }
 0x8d3   : > { %6388 = vmatpush3.msra.mxu1 %v8263_v14  ;;  %6362 = vmatprep.subr.mxu0 %v8241_v22 }
 0x8d4   : > { %6389 = vmatprep.subr.mxu1 %v8276_v28  ;;  %6363 = vmatpush3.msra.mxu0 %v8241_v22  ;;  %v3535_v22 = vadd.f32 %v8190_v39, %v8186_v23 }
 0x8d5   : > { %6390 = vmatpush3.msra.mxu1 %v8276_v28  ;;  %6364 = vmatprep.subr.mxu0 %v8255_v32 }
 0x8d6   : > { %6392 = vmatmul.mubr.f32.vlgmr.msra.gmra.mxu1 %v4876_v37  ;;  %6413 = vmatprep.subr.mxu1 %v8204_v62 }
 0x8d7   : > { %6365 = vmatpush3.msra.mxu0 %v8255_v32  ;;  %6414 = vmatpush3.msra.mxu1 %v8204_v62  ;;  %v5494_v32 = vld [vmem:[%s8434_s4] ss:$0 sm:$0xff] }
 0x8d8   : > { %6429 = vmatprep.mubr.f32.mxu1 %v4864_v41  ;;  %6366 = vmatprep.subr.mxu0 %v8261_v58  ;;  %v3630_v23 = vadd.f32 %v5494_v32, %v8188_v59 }
 0x8d9   : > { %6415 = vmatprep.subr.mxu1 %v8209_v1  ;;  %6367 = vmatpush3.msra.mxu0 %v8261_v58 }
 0x8da   : > { %6416 = vmatpush3.msra.mxu1 %v8209_v1  ;;  %6368 = vmatprep.subr.mxu0 %v8274_v44 }
 0x8db   : > { %6417 = vmatprep.subr.mxu1 %v8219_v24  ;;  %6369 = vmatpush3.msra.mxu0 %v8274_v44 }
 0x8dc   : > { %6418 = vmatpush3.msra.mxu1 %v8219_v24  ;;  %6370 = vmatprep.subr.mxu0 %v8288_v6 }
 0x8dd   : > { %6419 = vmatprep.subr.mxu1 %v8231_v3  ;;  %6371 = vmatpush3.msra.mxu0 %v8288_v6 }
 0x8de   : > { %6420 = vmatpush3.msra.mxu1 %v8231_v3  ;;  %6373 = vmatmul.mubr.f32.vlgmr.msra.gmra.mxu0 %v4875_v19 }
 0x8df   : > { %6394 = vmatprep.subr.mxu0 %v8214_v52  ;;  %6421 = vmatprep.subr.mxu1 %v8244_v48 }
 0x8e0   : > { %6395 = vmatpush3.msra.mxu0 %v8214_v52  ;;  %6410 = vmatprep.mubr.f32.mxu0 %v4864_v41 }
 0x8e1   : > { %6422 = vmatpush3.msra.mxu1 %v8244_v48  ;;  %6396 = vmatprep.subr.mxu0 %v8226_v25 }
 0x8e2   : > { %6423 = vmatprep.subr.mxu1 %v8252_v30  ;;  %6397 = vmatpush3.msra.mxu0 %v8226_v25 }
 0x8e3   : > { %6424 = vmatpush3.msra.mxu1 %v8252_v30  ;;  %6398 = vmatprep.subr.mxu0 %v8238_v47 }
 0x8e4   : > { %6425 = vmatprep.subr.mxu1 %v8263_v14  ;;  %6399 = vmatpush3.msra.mxu0 %v8238_v47 }
 0x8e5   : > { %6426 = vmatpush3.msra.mxu1 %v8263_v14  ;;  %6400 = vmatprep.subr.mxu0 %v8250_v9 }
 0x8e6   : > { %6427 = vmatprep.subr.mxu1 %v8276_v28  ;;  %6401 = vmatpush3.msra.mxu0 %v8250_v9 }
 0x8e7   : > { %6428 = vmatpush3.msra.mxu1 %v8276_v28  ;;  %6402 = vmatprep.subr.mxu0 %v8267_v45 }
 0x8e8   : > { %6430 = vmatmul.mubr.f32.vlgmr.msra.gmra.mxu1 %v8303_v13  ;;  %6403 = vmatpush3.msra.mxu0 %v8267_v45  ;;  %v3620_v45 = vadd.f32 %v8192_v0, %v3535_v22 }
 0x8e9   : > { %6404 = vmatprep.subr.mxu0 %v8271_v53 }
 0x8ea   : > { %6405 = vmatpush3.msra.mxu0 %v8271_v53 }
 0x8eb   : > { %6406 = vmatprep.subr.mxu0 %v8285_v54 }
 0x8ec   : > { %6407 = vmatpush3.msra.mxu0 %v8285_v54 }
 0x8ed   : > { %6408 = vmatprep.subr.mxu0 %v8295_v15 }
 0x8ee   : > { %6409 = vmatpush3.msra.mxu0 %v8295_v15  ;;  %v3629_v15 = vadd.f32 %v5494_v32, %v3620_v45 }
 0x8ef   : > { %6411 = vmatmul.mubr.f32.vlgmr.msra.gmra.mxu0 %v8303_v13 }
 0x985   : > { %v6355_v29 = vpop.f32.mrf.mxu1 }
 0x987   : > { %v4991_v49 = vpop.f32.mrf.mxu1 }
 0x98d   : > { %v6336_v62 = vpop.f32.mrf.mxu0 }
 0x98e   : > { %v4998_v24 = vadd.f32 %v6355_v29, %v6336_v62 }
 0x98f   : > { %v4870_v1 = vpop.f32.mrf.mxu0 }
 0x990   : > { %v4992_v3 = vadd.f32 %v4991_v49, %v4870_v1 }
 0x996   : > { %v6393_v25 = vpop.f32.mrf.mxu1 }
 0x998   : > { %v5173_v9 = vpop.f32.mrf.mxu1 }
 0x99e   : > { %v6374_v52 = vpop.f32.mrf.mxu0 }
 0x99f   : > { %v5093_v47 = vadd.f32 %v6374_v52, %v4998_v24 }
 0x9a0   : > { %v5085_v5 = vpop.f32.mrf.mxu0 }
 0x9a1   : > { %v5086_v48 = vadd.f32 %v5085_v5, %v4992_v3  ;;  %v5182_v30 = vadd.f32 %v6393_v25, %v5093_v47 }
 0x9a3   : > { %v5174_v44 = vadd.f32 %v5173_v9, %v5086_v48 }
 0x9a8   : > { %v6431_v58 = vpop.f32.mrf.mxu1 }
 0x9aa   : > { %v5361_v6 = vpop.f32.mrf.mxu1 }
 0x9af   : > { %v6412_v14 = vpop.f32.mrf.mxu0 }
 0x9b0   : > { %v5283_v53 = vadd.f32 %v6412_v14, %v5182_v30 }
 0x9b1   : > { %v5276_v28 = vpop.f32.mrf.mxu0 }
 0x9b2   : > { %v5368_v39 = vadd.f32 %v6431_v58, %v5283_v53  ;;  %v5277_v54 = vadd.f32 %v5276_v28, %v5174_v44 }
 0x9b4   : > { %v5372_v12 = vadd.f32 %v5368_v39, %v3630_v23  ;;  %v5362_v0 = vadd.f32 %v5361_v6, %v5277_v54 }
 0x9b6   : > { %5374 = vst [vmem:[%s271_s16 + $0x8] sm:$0xff] %v5372_v12  ;;  %v5371_v59 = vadd.f32 %v5362_v0, %v3629_v15 }
 0x9b8   : > { %5373 = vst [vmem:[%s271_s16] sm:$0xff] %v5371_v59 }
 0x9b9   : > { %6632 = shalt.err (!%p6629_p9)
}
 0x9ba   : > { %s6633_s24 = scalar_lea.hbm %s8387_s27, 256  ;;  %s6637_s10 = scalar_lea.hbm %s8435_s5, 512 }
 0x9bb   : > { %p6634_p13 = scmp.ne.s32.totalorder %s8387_s27, %s6633_s24  ;;  %p6638_p4 = scmp.lt.s32.totalorder %s8387_s27, %s8435_s5 }
 0x9bc   : > { %p6639_p8 = scmp.lt.s32.totalorder %s6637_s10, %s6633_s24 }
 0x9bd   : > { %p6635_p5 = pnand %p6634_p13, %p8628_p10 }
 0x9be   : > { %p6640_p7 = por %p6639_p8, %p6638_p4 }
 0x9bf   : > { %p6636_p0 = pneg %p6635_p5 }
 0x9c1   : > { %p6641_p11 = pnand %p6640_p7, %p6636_p0 }
 0x9c3   : > { %6644 = shalt.err (!%p6641_p11)
}
 0x9c4   : > { %s6699_s9 = smov 128   ;;  %s6700_s30 = smov 8  }
 0x9c5   : > { %6442 = dma.vmem_to_hbm [thread:$0]  (%p8628_p10), %s8382_s8, 256, %s8387_s27, %s5376_s23, %s6699_s9, %s6699_s9, %s6700_s30  }
 0x9c6 PF: > { %s5404_s11 = sand.u32 1, %s6675_s18   ;;  %p8629_p1 = scmp.ne.s32.totalorder %s8517_s25, 0 }
 0x9c7   : > { %p8630_p2 = scmp.ge.s32.totalorder %s6687_s21, 2  ;;  %s5405_s13 = scalar_lea.sflag [#allocation4], %s5404_s11 }
 0x9c9   : > { %p6456_p6 = pnand %p8630_p2, %p8629_p1 }
 0x9cb   : > { %p6457_p12 = pneg %p6456_p6 }
 0x9cd   : > { %6670 = dma.done.wait (%p6457_p12), %s5405_s13, 256  }
 0x9ce   : > { %6672 = vsyncadd (%p6457_p12), %s5405_s13, 4294967040  ;;  %p19_p3 = scmp.ge.s32.totalorder %s6806_s17, 4   ;;  %s8631_s18 = smov %s6679_s19 }
 0x9cf   : > { %s8632_s19 = smov %s6683_s20  ;;  %s8633_s20 = smov %s6815_s28 }
 0x9d0   : > { %s8634_s21 = smov %s6806_s17  ;;  %21 = sbr.rel (!%p19_p3) target bundleno = 6 (0x6), region = 93 }
 0x9d5   :  { %5410 = vsyncpa [#allocation3], 1 }
 0x9d6   :  { %5412 = vsyncpa [#allocation3 + $0x1], 1 }
 0x9d7   :  { %5413 = vsyncpa [#allocation6], 1 }
 0x9d8   :  { %5414 = vsyncpa [#allocation4], 1 }
 0x9d9   :  { %5416 = vsyncpa [#allocation4 + $0x1], 1 }

</bundles_post_ra>
